<compile_context>
chip_gen: v6e
topology: v6e:2x2x1
jax: 0.10.0
libtpu: 0.0.40
codegen_flags: <defaults>
</compile_context>

<pallas_src>
import math

import jax
import jax.numpy as jnp
from jax.experimental import pallas as pl
from jax.experimental.pallas import tpu as pltpu


# ----------------------------- config (small) --------------------------------
BATCH = 2
SEQ = 8
HIDDEN = 32
NUM_HEADS = 2
NUM_KV_HEADS = 1
HEAD_DIM = 16            # NUM_HEADS * HEAD_DIM == HIDDEN (required by o_proj)
INTERMEDIATE = 64
NUM_LAYERS = 2
ROPE_THETA = 10000.0
RMS_EPS = 1e-6           # GemmaRMSNorm default eps
MASK_NEG = -1e9

BS = BATCH * SEQ
QD = NUM_HEADS * HEAD_DIM
KVD = NUM_KV_HEADS * HEAD_DIM
GROUP = NUM_HEADS // NUM_KV_HEADS


# ------------------------------ fused kernel ---------------------------------
def _rotate_half_heads(x, n_heads):
    """rotate_half applied per HEAD_DIM group of a (BS, n_heads*HEAD_DIM) block."""
    half = HEAD_DIM // 2
    parts = []
    for h in range(n_heads):
        x1 = x[:, h * HEAD_DIM: h * HEAD_DIM + half]
        x2 = x[:, h * HEAD_DIM + half: (h + 1) * HEAD_DIM]
        parts.append(-x2)
        parts.append(x1)
    return jnp.concatenate(parts, axis=-1)


def _rmsnorm(x, w_row):
    """GemmaRMSNorm: f32 statistics, scale = (1 + weight)."""
    var = jnp.mean(x * x, axis=-1, keepdims=True)
    return (x * jax.lax.rsqrt(var + RMS_EPS)) * (1.0 + w_row)


def _decoder_stack_kernel(
    x_ref, cosq_ref, sinq_ref, cosk_ref, sink_ref, mask_ref,   # activations / tables
    ln1_ref, wqkv_ref, wo_ref, ln2_ref, wgu_ref, wd_ref,       # stacked per-layer weights
    out_ref,
):
    h = x_ref[...].astype(jnp.float32)           # (BS, H) residual stream (f32)
    cos_q = cosq_ref[...]                        # (BS, QD)
    sin_q = sinq_ref[...]
    cos_k = cosk_ref[...]                        # (BS, KVD)
    sin_k = sink_ref[...]
    mask = mask_ref[...]                         # (BS, BS) block-diag causal additive mask
    scale = 1.0 / math.sqrt(HEAD_DIM)
    c0 = 0.7978845608028654                      # sqrt(2/pi) for gelu(tanh)

    for l in range(NUM_LAYERS):                  # static unroll; weights VMEM-resident
        # ---------------- self-attention block ----------------
        hn = _rmsnorm(h, ln1_ref[l]).astype(jnp.bfloat16)            # (BS, H)
        qkv = jnp.dot(hn, wqkv_ref[l], preferred_element_type=jnp.float32)
        q = qkv[:, :QD]                                              # (BS, QD)
        k = qkv[:, QD:QD + KVD]                                      # (BS, KVD)
        v = qkv[:, QD + KVD:]                                        # (BS, KVD)

        # full-width RoPE (rotate_half per head group), one pass for q and one for k
        q = (q * cos_q + _rotate_half_heads(q, NUM_HEADS) * sin_q).astype(jnp.bfloat16)
        k = (k * cos_k + _rotate_half_heads(k, NUM_KV_HEADS) * sin_k).astype(jnp.bfloat16)
        v = v.astype(jnp.bfloat16)

        head_outs = []
        for hd in range(NUM_HEADS):              # static unroll over query heads
            kvh = hd // GROUP                    # GQA: shared KV head
            q_h = q[:, hd * HEAD_DIM:(hd + 1) * HEAD_DIM]
            k_h = k[:, kvh * HEAD_DIM:(kvh + 1) * HEAD_DIM]
            v_h = v[:, kvh * HEAD_DIM:(kvh + 1) * HEAD_DIM]
            s = jnp.dot(q_h, k_h.T, preferred_element_type=jnp.float32) * scale + mask
            m = jnp.max(s, axis=-1, keepdims=True)
            p = jnp.exp(s - m)
            p = p * pl.reciprocal(jnp.sum(p, axis=-1, keepdims=True), approx=True)
            head_outs.append(jnp.dot(p.astype(jnp.bfloat16), v_h,
                                     preferred_element_type=jnp.float32))
        attn = jnp.concatenate(head_outs, axis=-1).astype(jnp.bfloat16)   # (BS, QD)
        h = h + jnp.dot(attn, wo_ref[l], preferred_element_type=jnp.float32)

        # ---------------- MLP block ----------------
        hn2 = _rmsnorm(h, ln2_ref[l]).astype(jnp.bfloat16)
        gu = jnp.dot(hn2, wgu_ref[l], preferred_element_type=jnp.float32)  # (BS, 2*I)
        g = gu[:, :INTERMEDIATE]
        u = gu[:, INTERMEDIATE:]
        g = 0.5 * g * (1.0 + jnp.tanh(c0 * (g + 0.044715 * g * g * g)))    # gelu(tanh), f32
        h = h + jnp.dot((g * u).astype(jnp.bfloat16), wd_ref[l],
                        preferred_element_type=jnp.float32)

    out_ref[...] = h


# ----------------------------- parameter setup --------------------------------
def init_params(key):
    keys = jax.random.split(key, 7)

    def w(k, *shape, scale=0.02):
        return jax.random.normal(k, shape, jnp.float32) * scale

    L, H, I = NUM_LAYERS, HIDDEN, INTERMEDIATE
    return {
        # GemmaRMSNorm initializes its weight to zeros (scale = 1 + w).
        "ln1_w": jnp.zeros((L, 1, H), jnp.float32),
        "ln2_w": jnp.zeros((L, 1, H), jnp.float32),
        "wq": w(keys[0], L, H, QD),
        "wk": w(keys[1], L, H, KVD),
        "wv": w(keys[2], L, H, KVD),
        "wo": w(keys[3], L, QD, H),
        "wg": w(keys[4], L, H, I),
        "wu": w(keys[5], L, H, I),
        "wd": w(keys[6], L, I, H),
    }


def rotary_tables(position_ids, head_dim, theta):
    # position_ids: (B, S) int32 -> cos/sin: (B, S, head_dim) float32
    inv_freq = 1.0 / (theta ** (jnp.arange(0, head_dim, 2, dtype=jnp.float32) / head_dim))
    freqs = position_ids.astype(jnp.float32)[..., None] * inv_freq[None, None, :]
    emb = jnp.concatenate([freqs, freqs], axis=-1)
    return jnp.cos(emb), jnp.sin(emb)


# ------------------------------ forward pass ----------------------------------
def decoder_stack_forward(params, hidden_states, position_ids, attention_mask):
    """NUM_LAYERS Gemma DecoderLayers (kv_cache=None path) in a single pallas_call."""
    B, S, H = hidden_states.shape

    cos, sin = rotary_tables(position_ids, HEAD_DIM, ROPE_THETA)        # (B, S, D)
    cos2d = cos.reshape(BS, HEAD_DIM).astype(jnp.float32)
    sin2d = sin.reshape(BS, HEAD_DIM).astype(jnp.float32)
    cos_q = jnp.tile(cos2d, (1, NUM_HEADS))                             # (BS, QD)
    sin_q = jnp.tile(sin2d, (1, NUM_HEADS))
    cos_k = jnp.tile(cos2d, (1, NUM_KV_HEADS))                          # (BS, KVD)
    sin_k = jnp.tile(sin2d, (1, NUM_KV_HEADS))

    x2d = hidden_states.reshape(BS, H).astype(jnp.float32)

    # block-diagonal additive mask over the flattened (B*S) token axis
    mb = attention_mask[:, 0].astype(jnp.float32)                       # (B, S, S)
    off = jnp.full((SEQ, SEQ), MASK_NEG, jnp.float32)
    mask_bd = jnp.concatenate(
        [jnp.concatenate([mb[b] if bb == b else off for bb in range(B)], axis=1)
         for b in range(B)], axis=0)                                    # (BS, BS)

    # host-side weight fusion + bf16 cast for MXU operands
    wqkv = jnp.concatenate([params["wq"], params["wk"], params["wv"]],
                           axis=-1).astype(jnp.bfloat16)                # (L, H, QD+2*KVD)
    wgu = jnp.concatenate([params["wg"], params["wu"]],
                          axis=-1).astype(jnp.bfloat16)                 # (L, H, 2*I)
    wo = params["wo"].astype(jnp.bfloat16)
    wd = params["wd"].astype(jnp.bfloat16)

    vmem = pl.BlockSpec(memory_space=pltpu.MemorySpace.VMEM)
    out2d = pl.pallas_call(
        _decoder_stack_kernel,
        out_shape=jax.ShapeDtypeStruct((BS, H), jnp.float32),
        in_specs=[vmem] * 12,
        out_specs=vmem,
    )(x2d, cos_q, sin_q, cos_k, sin_k, mask_bd,
      params["ln1_w"], wqkv, wo, params["ln2_w"], wgu, wd)

    # TODO(synk): KVCache (incremental decode) path is not exercised; this is the
    #             full-sequence (kv_cache=None) forward, matching the reference.
    return out2d.reshape(B, S, H)


# --------------------------------- main ---------------------------------------
if __name__ == "__main__":
    key = jax.random.PRNGKey(0)
    pkey, xkey = jax.random.split(key)
    params = init_params(pkey)

    hidden_states = jax.random.normal(xkey, (BATCH, SEQ, HIDDEN), jnp.float32)
    position_ids = jnp.broadcast_to(jnp.arange(SEQ, dtype=jnp.int32)[None, :], (BATCH, SEQ))

    # causal additive attention mask, shape (B, 1, S, S) as the module expects
    causal = jnp.tril(jnp.ones((SEQ, SEQ), jnp.bool_))
    attention_mask = jnp.where(causal, 0.0, MASK_NEG).astype(jnp.float32)
    attention_mask = jnp.broadcast_to(attention_mask[None, None], (BATCH, 1, SEQ, SEQ))

    fwd = jax.jit(decoder_stack_forward)
    out = fwd(params, hidden_states, position_ids, attention_mask)
    out = jax.block_until_ready(out)
    assert out.shape == (BATCH, SEQ, HIDDEN)
    assert bool(jnp.all(jnp.isfinite(out)))
    print("KERNEL_OK")
</pallas_src>

<mosaic_0001>
module attributes {stable_mosaic.version = 11 : i64} {
  func.func @_decoder_stack_kernel(%arg0: memref<16x32xf32, #tpu.memory_space<vmem>>, %arg1: memref<16x32xf32, #tpu.memory_space<vmem>>, %arg2: memref<16x32xf32, #tpu.memory_space<vmem>>, %arg3: memref<16x16xf32, #tpu.memory_space<vmem>>, %arg4: memref<16x16xf32, #tpu.memory_space<vmem>>, %arg5: memref<16x16xf32, #tpu.memory_space<vmem>>, %arg6: memref<2x1x32xf32, #tpu.memory_space<vmem>>, %arg7: memref<2x32x64xbf16, #tpu.memory_space<vmem>>, %arg8: memref<2x32x32xbf16, #tpu.memory_space<vmem>>, %arg9: memref<2x1x32xf32, #tpu.memory_space<vmem>>, %arg10: memref<2x32x128xbf16, #tpu.memory_space<vmem>>, %arg11: memref<2x64x32xbf16, #tpu.memory_space<vmem>>, %arg12: memref<16x32xf32, #tpu.memory_space<vmem>>) attributes {dimension_semantics = [], scalar_prefetch = 0 : i64, scratch_operands = 0 : i64, tpu.core_type = #tpu.core_type<tc>} {
    %c0 = arith.constant 0 : index
    %c0_0 = arith.constant 0 : index
    %0 = vector.load %arg0[%c0, %c0_0] : memref<16x32xf32, #tpu.memory_space<vmem>>, vector<16x32xf32>
    %c0_1 = arith.constant 0 : index
    %c0_2 = arith.constant 0 : index
    %1 = vector.load %arg1[%c0_1, %c0_2] : memref<16x32xf32, #tpu.memory_space<vmem>>, vector<16x32xf32>
    %c0_3 = arith.constant 0 : index
    %c0_4 = arith.constant 0 : index
    %2 = vector.load %arg2[%c0_3, %c0_4] : memref<16x32xf32, #tpu.memory_space<vmem>>, vector<16x32xf32>
    %c0_5 = arith.constant 0 : index
    %c0_6 = arith.constant 0 : index
    %3 = vector.load %arg3[%c0_5, %c0_6] : memref<16x16xf32, #tpu.memory_space<vmem>>, vector<16x16xf32>
    %c0_7 = arith.constant 0 : index
    %c0_8 = arith.constant 0 : index
    %4 = vector.load %arg4[%c0_7, %c0_8] : memref<16x16xf32, #tpu.memory_space<vmem>>, vector<16x16xf32>
    %c0_9 = arith.constant 0 : index
    %c0_10 = arith.constant 0 : index
    %5 = vector.load %arg5[%c0_9, %c0_10] : memref<16x16xf32, #tpu.memory_space<vmem>>, vector<16x16xf32>
    %c0_11 = arith.constant 0 : index
    %c0_12 = arith.constant 0 : index
    %c0_13 = arith.constant 0 : index
    %6 = vector.load %arg6[%c0_11, %c0_12, %c0_13] : memref<2x1x32xf32, #tpu.memory_space<vmem>>, vector<1x1x32xf32>
    %7 = vector.shape_cast %6 : vector<1x1x32xf32> to vector<1x32xf32>
    %8 = arith.mulf %0, %0 : vector<16x32xf32>
    %cst = arith.constant dense<0.000000e+00> : vector<16xf32>
    %9 = vector.multi_reduction <add>, %8, %cst [1] : vector<16x32xf32> to vector<16xf32>
    %10 = vector.shape_cast %9 : vector<16xf32> to vector<16x1xf32>
    %cst_14 = arith.constant 3.200000e+01 : f32
    %11 = vector.broadcast %cst_14 : f32 to vector<16x1xf32>
    %12 = arith.divf %10, %11 : vector<16x1xf32>
    %cst_15 = arith.constant 9.99999997E-7 : f32
    %13 = vector.broadcast %cst_15 : f32 to vector<16x1xf32>
    %14 = arith.addf %12, %13 : vector<16x1xf32>
    %15 = math.rsqrt %14 : vector<16x1xf32>
    %16 = vector.broadcast %15 : vector<16x1xf32> to vector<16x32xf32>
    %17 = arith.mulf %0, %16 : vector<16x32xf32>
    %cst_16 = arith.constant 1.000000e+00 : f32
    %18 = vector.broadcast %cst_16 : f32 to vector<1x32xf32>
    %19 = arith.addf %18, %7 : vector<1x32xf32>
    %20 = vector.broadcast %19 : vector<1x32xf32> to vector<16x32xf32>
    %21 = arith.mulf %17, %20 : vector<16x32xf32>
    %22 = arith.truncf %21 : vector<16x32xf32> to vector<16x32xbf16>
    %c0_17 = arith.constant 0 : index
    %c0_18 = arith.constant 0 : index
    %c0_19 = arith.constant 0 : index
    %23 = vector.load %arg7[%c0_17, %c0_18, %c0_19] : memref<2x32x64xbf16, #tpu.memory_space<vmem>>, vector<1x32x64xbf16>
    %24 = vector.shape_cast %23 : vector<1x32x64xbf16> to vector<32x64xbf16>
    %cst_20 = arith.constant dense<0.000000e+00> : vector<16x64xf32>
    %25 = tpu.matmul %22, %24, %cst_20 {dimension_numbers = #tpu.dot_dimension_numbers<[1], [0], [0], [1], [0, 0, 1, 1], [], []>} : vector<16x32xbf16>, vector<32x64xbf16>, vector<16x64xf32> -> vector<16x64xf32>
    %26 = vector.extract_strided_slice %25 {offsets = [0, 0], sizes = [16, 32], strides = [1, 1]} : vector<16x64xf32> to vector<16x32xf32>
    %27 = vector.extract_strided_slice %25 {offsets = [0, 32], sizes = [16, 16], strides = [1, 1]} : vector<16x64xf32> to vector<16x16xf32>
    %28 = vector.extract_strided_slice %25 {offsets = [0, 48], sizes = [16, 16], strides = [1, 1]} : vector<16x64xf32> to vector<16x16xf32>
    %29 = arith.mulf %26, %1 : vector<16x32xf32>
    %30 = vector.extract_strided_slice %26 {offsets = [0, 0], sizes = [16, 8], strides = [1, 1]} : vector<16x32xf32> to vector<16x8xf32>
    %31 = vector.extract_strided_slice %26 {offsets = [0, 8], sizes = [16, 8], strides = [1, 1]} : vector<16x32xf32> to vector<16x8xf32>
    %cst_21 = arith.constant 0.000000e+00 : f32
    %32 = vector.broadcast %cst_21 : f32 to vector<16x8xf32>
    %33 = arith.subf %32, %31 : vector<16x8xf32>
    %34 = vector.extract_strided_slice %26 {offsets = [0, 16], sizes = [16, 8], strides = [1, 1]} : vector<16x32xf32> to vector<16x8xf32>
    %35 = vector.extract_strided_slice %26 {offsets = [0, 24], sizes = [16, 8], strides = [1, 1]} : vector<16x32xf32> to vector<16x8xf32>
    %cst_22 = arith.constant 0.000000e+00 : f32
    %36 = vector.broadcast %cst_22 : f32 to vector<16x8xf32>
    %37 = arith.subf %36, %35 : vector<16x8xf32>
    %38 = tpu.concatenate %33, %30, %37, %34 in 1 : vector<16x8xf32>, vector<16x8xf32>, vector<16x8xf32>, vector<16x8xf32> -> vector<16x32xf32>
    %39 = arith.mulf %38, %2 : vector<16x32xf32>
    %40 = arith.addf %29, %39 : vector<16x32xf32>
    %41 = arith.truncf %40 : vector<16x32xf32> to vector<16x32xbf16>
    %42 = arith.mulf %27, %3 : vector<16x16xf32>
    %43 = vector.extract_strided_slice %27 {offsets = [0, 0], sizes = [16, 8], strides = [1, 1]} : vector<16x16xf32> to vector<16x8xf32>
    %44 = vector.extract_strided_slice %27 {offsets = [0, 8], sizes = [16, 8], strides = [1, 1]} : vector<16x16xf32> to vector<16x8xf32>
    %cst_23 = arith.constant 0.000000e+00 : f32
    %45 = vector.broadcast %cst_23 : f32 to vector<16x8xf32>
    %46 = arith.subf %45, %44 : vector<16x8xf32>
    %47 = tpu.concatenate %46, %43 in 1 : vector<16x8xf32>, vector<16x8xf32> -> vector<16x16xf32>
    %48 = arith.mulf %47, %4 : vector<16x16xf32>
    %49 = arith.addf %42, %48 : vector<16x16xf32>
    %50 = arith.truncf %49 : vector<16x16xf32> to vector<16x16xbf16>
    %51 = arith.truncf %28 : vector<16x16xf32> to vector<16x16xbf16>
    %52 = vector.extract_strided_slice %41 {offsets = [0, 0], sizes = [16, 16], strides = [1, 1]} : vector<16x32xbf16> to vector<16x16xbf16>
    %53 = tpu.transpose %50, [1, 0] : vector<16x16xbf16> -> vector<16x16xbf16>
    %cst_24 = arith.constant dense<0.000000e+00> : vector<16x16xf32>
    %54 = tpu.matmul %52, %53, %cst_24 {dimension_numbers = #tpu.dot_dimension_numbers<[1], [0], [0], [1], [0, 0, 1, 1], [], []>} : vector<16x16xbf16>, vector<16x16xbf16>, vector<16x16xf32> -> vector<16x16xf32>
    %cst_25 = arith.constant 2.500000e-01 : f32
    %55 = vector.broadcast %cst_25 : f32 to vector<16x16xf32>
    %56 = arith.mulf %54, %55 : vector<16x16xf32>
    %57 = arith.addf %56, %5 : vector<16x16xf32>
    %cst_26 = arith.constant dense<0xFF800000> : vector<16xf32>
    %58 = vector.multi_reduction <maximumf>, %57, %cst_26 [1] : vector<16x16xf32> to vector<16xf32>
    %59 = vector.shape_cast %58 : vector<16xf32> to vector<16x1xf32>
    %60 = vector.broadcast %59 : vector<16x1xf32> to vector<16x16xf32>
    %61 = arith.subf %57, %60 : vector<16x16xf32>
    %62 = math.exp %61 : vector<16x16xf32>
    %cst_27 = arith.constant dense<0.000000e+00> : vector<16xf32>
    %63 = vector.multi_reduction <add>, %62, %cst_27 [1] : vector<16x16xf32> to vector<16xf32>
    %64 = vector.shape_cast %63 : vector<16xf32> to vector<16x1xf32>
    %65 = tpu.reciprocal %64 {approx = true} : vector<16x1xf32> -> vector<16x1xf32>
    %66 = vector.broadcast %65 : vector<16x1xf32> to vector<16x16xf32>
    %67 = arith.mulf %62, %66 : vector<16x16xf32>
    %68 = arith.truncf %67 : vector<16x16xf32> to vector<16x16xbf16>
    %cst_28 = arith.constant dense<0.000000e+00> : vector<16x16xf32>
    %69 = tpu.matmul %68, %51, %cst_28 {dimension_numbers = #tpu.dot_dimension_numbers<[1], [0], [0], [1], [0, 0, 1, 1], [], []>} : vector<16x16xbf16>, vector<16x16xbf16>, vector<16x16xf32> -> vector<16x16xf32>
    %70 = vector.extract_strided_slice %41 {offsets = [0, 16], sizes = [16, 16], strides = [1, 1]} : vector<16x32xbf16> to vector<16x16xbf16>
    %71 = tpu.transpose %50, [1, 0] : vector<16x16xbf16> -> vector<16x16xbf16>
    %cst_29 = arith.constant dense<0.000000e+00> : vector<16x16xf32>
    %72 = tpu.matmul %70, %71, %cst_29 {dimension_numbers = #tpu.dot_dimension_numbers<[1], [0], [0], [1], [0, 0, 1, 1], [], []>} : vector<16x16xbf16>, vector<16x16xbf16>, vector<16x16xf32> -> vector<16x16xf32>
    %cst_30 = arith.constant 2.500000e-01 : f32
    %73 = vector.broadcast %cst_30 : f32 to vector<16x16xf32>
    %74 = arith.mulf %72, %73 : vector<16x16xf32>
    %75 = arith.addf %74, %5 : vector<16x16xf32>
    %cst_31 = arith.constant dense<0xFF800000> : vector<16xf32>
    %76 = vector.multi_reduction <maximumf>, %75, %cst_31 [1] : vector<16x16xf32> to vector<16xf32>
    %77 = vector.shape_cast %76 : vector<16xf32> to vector<16x1xf32>
    %78 = vector.broadcast %77 : vector<16x1xf32> to vector<16x16xf32>
    %79 = arith.subf %75, %78 : vector<16x16xf32>
    %80 = math.exp %79 : vector<16x16xf32>
    %cst_32 = arith.constant dense<0.000000e+00> : vector<16xf32>
    %81 = vector.multi_reduction <add>, %80, %cst_32 [1] : vector<16x16xf32> to vector<16xf32>
    %82 = vector.shape_cast %81 : vector<16xf32> to vector<16x1xf32>
    %83 = tpu.reciprocal %82 {approx = true} : vector<16x1xf32> -> vector<16x1xf32>
    %84 = vector.broadcast %83 : vector<16x1xf32> to vector<16x16xf32>
    %85 = arith.mulf %80, %84 : vector<16x16xf32>
    %86 = arith.truncf %85 : vector<16x16xf32> to vector<16x16xbf16>
    %cst_33 = arith.constant dense<0.000000e+00> : vector<16x16xf32>
    %87 = tpu.matmul %86, %51, %cst_33 {dimension_numbers = #tpu.dot_dimension_numbers<[1], [0], [0], [1], [0, 0, 1, 1], [], []>} : vector<16x16xbf16>, vector<16x16xbf16>, vector<16x16xf32> -> vector<16x16xf32>
    %88 = tpu.concatenate %69, %87 in 1 : vector<16x16xf32>, vector<16x16xf32> -> vector<16x32xf32>
    %89 = arith.truncf %88 : vector<16x32xf32> to vector<16x32xbf16>
    %c0_34 = arith.constant 0 : index
    %c0_35 = arith.constant 0 : index
    %c0_36 = arith.constant 0 : index
    %90 = vector.load %arg8[%c0_34, %c0_35, %c0_36] : memref<2x32x32xbf16, #tpu.memory_space<vmem>>, vector<1x32x32xbf16>
    %91 = vector.shape_cast %90 : vector<1x32x32xbf16> to vector<32x32xbf16>
    %cst_37 = arith.constant dense<0.000000e+00> : vector<16x32xf32>
    %92 = tpu.matmul %89, %91, %cst_37 {dimension_numbers = #tpu.dot_dimension_numbers<[1], [0], [0], [1], [0, 0, 1, 1], [], []>} : vector<16x32xbf16>, vector<32x32xbf16>, vector<16x32xf32> -> vector<16x32xf32>
    %93 = arith.addf %0, %92 : vector<16x32xf32>
    %c0_38 = arith.constant 0 : index
    %c0_39 = arith.constant 0 : index
    %c0_40 = arith.constant 0 : index
    %94 = vector.load %arg9[%c0_38, %c0_39, %c0_40] : memref<2x1x32xf32, #tpu.memory_space<vmem>>, vector<1x1x32xf32>
    %95 = vector.shape_cast %94 : vector<1x1x32xf32> to vector<1x32xf32>
    %96 = arith.mulf %93, %93 : vector<16x32xf32>
    %cst_41 = arith.constant dense<0.000000e+00> : vector<16xf32>
    %97 = vector.multi_reduction <add>, %96, %cst_41 [1] : vector<16x32xf32> to vector<16xf32>
    %98 = vector.shape_cast %97 : vector<16xf32> to vector<16x1xf32>
    %cst_42 = arith.constant 3.200000e+01 : f32
    %99 = vector.broadcast %cst_42 : f32 to vector<16x1xf32>
    %100 = arith.divf %98, %99 : vector<16x1xf32>
    %cst_43 = arith.constant 9.99999997E-7 : f32
    %101 = vector.broadcast %cst_43 : f32 to vector<16x1xf32>
    %102 = arith.addf %100, %101 : vector<16x1xf32>
    %103 = math.rsqrt %102 : vector<16x1xf32>
    %104 = vector.broadcast %103 : vector<16x1xf32> to vector<16x32xf32>
    %105 = arith.mulf %93, %104 : vector<16x32xf32>
    %cst_44 = arith.constant 1.000000e+00 : f32
    %106 = vector.broadcast %cst_44 : f32 to vector<1x32xf32>
    %107 = arith.addf %106, %95 : vector<1x32xf32>
    %108 = vector.broadcast %107 : vector<1x32xf32> to vector<16x32xf32>
    %109 = arith.mulf %105, %108 : vector<16x32xf32>
    %110 = arith.truncf %109 : vector<16x32xf32> to vector<16x32xbf16>
    %c0_45 = arith.constant 0 : index
    %c0_46 = arith.constant 0 : index
    %c0_47 = arith.constant 0 : index
    %111 = vector.load %arg10[%c0_45, %c0_46, %c0_47] : memref<2x32x128xbf16, #tpu.memory_space<vmem>>, vector<1x32x128xbf16>
    %112 = vector.shape_cast %111 : vector<1x32x128xbf16> to vector<32x128xbf16>
    %cst_48 = arith.constant dense<0.000000e+00> : vector<16x128xf32>
    %113 = tpu.matmul %110, %112, %cst_48 {dimension_numbers = #tpu.dot_dimension_numbers<[1], [0], [0], [1], [0, 0, 1, 1], [], []>} : vector<16x32xbf16>, vector<32x128xbf16>, vector<16x128xf32> -> vector<16x128xf32>
    %114 = vector.extract_strided_slice %113 {offsets = [0, 0], sizes = [16, 64], strides = [1, 1]} : vector<16x128xf32> to vector<16x64xf32>
    %115 = vector.extract_strided_slice %113 {offsets = [0, 64], sizes = [16, 64], strides = [1, 1]} : vector<16x128xf32> to vector<16x64xf32>
    %cst_49 = arith.constant 5.000000e-01 : f32
    %116 = vector.broadcast %cst_49 : f32 to vector<16x64xf32>
    %117 = arith.mulf %116, %114 : vector<16x64xf32>
    %cst_50 = arith.constant 4.471500e-02 : f32
    %118 = vector.broadcast %cst_50 : f32 to vector<16x64xf32>
    %119 = arith.mulf %118, %114 : vector<16x64xf32>
    %120 = arith.mulf %119, %114 : vector<16x64xf32>
    %121 = arith.mulf %120, %114 : vector<16x64xf32>
    %122 = arith.addf %114, %121 : vector<16x64xf32>
    %cst_51 = arith.constant 0.797884583 : f32
    %123 = vector.broadcast %cst_51 : f32 to vector<16x64xf32>
    %124 = arith.mulf %123, %122 : vector<16x64xf32>
    %125 = math.tanh %124 : vector<16x64xf32>
    %cst_52 = arith.constant 1.000000e+00 : f32
    %126 = vector.broadcast %cst_52 : f32 to vector<16x64xf32>
    %127 = arith.addf %126, %125 : vector<16x64xf32>
    %128 = arith.mulf %117, %127 : vector<16x64xf32>
    %129 = arith.mulf %128, %115 : vector<16x64xf32>
    %130 = arith.truncf %129 : vector<16x64xf32> to vector<16x64xbf16>
    %c0_53 = arith.constant 0 : index
    %c0_54 = arith.constant 0 : index
    %c0_55 = arith.constant 0 : index
    %131 = vector.load %arg11[%c0_53, %c0_54, %c0_55] : memref<2x64x32xbf16, #tpu.memory_space<vmem>>, vector<1x64x32xbf16>
    %132 = vector.shape_cast %131 : vector<1x64x32xbf16> to vector<64x32xbf16>
    %cst_56 = arith.constant dense<0.000000e+00> : vector<16x32xf32>
    %133 = tpu.matmul %130, %132, %cst_56 {dimension_numbers = #tpu.dot_dimension_numbers<[1], [0], [0], [1], [0, 0, 1, 1], [], []>} : vector<16x64xbf16>, vector<64x32xbf16>, vector<16x32xf32> -> vector<16x32xf32>
    %134 = arith.addf %93, %133 : vector<16x32xf32>
    %c1 = arith.constant 1 : index
    %c0_57 = arith.constant 0 : index
    %c0_58 = arith.constant 0 : index
    %135 = vector.load %arg6[%c1, %c0_57, %c0_58] : memref<2x1x32xf32, #tpu.memory_space<vmem>>, vector<1x1x32xf32>
    %136 = vector.shape_cast %135 : vector<1x1x32xf32> to vector<1x32xf32>
    %137 = arith.mulf %134, %134 : vector<16x32xf32>
    %cst_59 = arith.constant dense<0.000000e+00> : vector<16xf32>
    %138 = vector.multi_reduction <add>, %137, %cst_59 [1] : vector<16x32xf32> to vector<16xf32>
    %139 = vector.shape_cast %138 : vector<16xf32> to vector<16x1xf32>
    %cst_60 = arith.constant 3.200000e+01 : f32
    %140 = vector.broadcast %cst_60 : f32 to vector<16x1xf32>
    %141 = arith.divf %139, %140 : vector<16x1xf32>
    %cst_61 = arith.constant 9.99999997E-7 : f32
    %142 = vector.broadcast %cst_61 : f32 to vector<16x1xf32>
    %143 = arith.addf %141, %142 : vector<16x1xf32>
    %144 = math.rsqrt %143 : vector<16x1xf32>
    %145 = vector.broadcast %144 : vector<16x1xf32> to vector<16x32xf32>
    %146 = arith.mulf %134, %145 : vector<16x32xf32>
    %cst_62 = arith.constant 1.000000e+00 : f32
    %147 = vector.broadcast %cst_62 : f32 to vector<1x32xf32>
    %148 = arith.addf %147, %136 : vector<1x32xf32>
    %149 = vector.broadcast %148 : vector<1x32xf32> to vector<16x32xf32>
    %150 = arith.mulf %146, %149 : vector<16x32xf32>
    %151 = arith.truncf %150 : vector<16x32xf32> to vector<16x32xbf16>
    %c1_63 = arith.constant 1 : index
    %c0_64 = arith.constant 0 : index
    %c0_65 = arith.constant 0 : index
    %152 = vector.load %arg7[%c1_63, %c0_64, %c0_65] : memref<2x32x64xbf16, #tpu.memory_space<vmem>>, vector<1x32x64xbf16>
    %153 = vector.shape_cast %152 : vector<1x32x64xbf16> to vector<32x64xbf16>
    %cst_66 = arith.constant dense<0.000000e+00> : vector<16x64xf32>
    %154 = tpu.matmul %151, %153, %cst_66 {dimension_numbers = #tpu.dot_dimension_numbers<[1], [0], [0], [1], [0, 0, 1, 1], [], []>} : vector<16x32xbf16>, vector<32x64xbf16>, vector<16x64xf32> -> vector<16x64xf32>
    %155 = vector.extract_strided_slice %154 {offsets = [0, 0], sizes = [16, 32], strides = [1, 1]} : vector<16x64xf32> to vector<16x32xf32>
    %156 = vector.extract_strided_slice %154 {offsets = [0, 32], sizes = [16, 16], strides = [1, 1]} : vector<16x64xf32> to vector<16x16xf32>
    %157 = vector.extract_strided_slice %154 {offsets = [0, 48], sizes = [16, 16], strides = [1, 1]} : vector<16x64xf32> to vector<16x16xf32>
    %158 = arith.mulf %155, %1 : vector<16x32xf32>
    %159 = vector.extract_strided_slice %155 {offsets = [0, 0], sizes = [16, 8], strides = [1, 1]} : vector<16x32xf32> to vector<16x8xf32>
    %160 = vector.extract_strided_slice %155 {offsets = [0, 8], sizes = [16, 8], strides = [1, 1]} : vector<16x32xf32> to vector<16x8xf32>
    %cst_67 = arith.constant 0.000000e+00 : f32
    %161 = vector.broadcast %cst_67 : f32 to vector<16x8xf32>
    %162 = arith.subf %161, %160 : vector<16x8xf32>
    %163 = vector.extract_strided_slice %155 {offsets = [0, 16], sizes = [16, 8], strides = [1, 1]} : vector<16x32xf32> to vector<16x8xf32>
    %164 = vector.extract_strided_slice %155 {offsets = [0, 24], sizes = [16, 8], strides = [1, 1]} : vector<16x32xf32> to vector<16x8xf32>
    %cst_68 = arith.constant 0.000000e+00 : f32
    %165 = vector.broadcast %cst_68 : f32 to vector<16x8xf32>
    %166 = arith.subf %165, %164 : vector<16x8xf32>
    %167 = tpu.concatenate %162, %159, %166, %163 in 1 : vector<16x8xf32>, vector<16x8xf32>, vector<16x8xf32>, vector<16x8xf32> -> vector<16x32xf32>
    %168 = arith.mulf %167, %2 : vector<16x32xf32>
    %169 = arith.addf %158, %168 : vector<16x32xf32>
    %170 = arith.truncf %169 : vector<16x32xf32> to vector<16x32xbf16>
    %171 = arith.mulf %156, %3 : vector<16x16xf32>
    %172 = vector.extract_strided_slice %156 {offsets = [0, 0], sizes = [16, 8], strides = [1, 1]} : vector<16x16xf32> to vector<16x8xf32>
    %173 = vector.extract_strided_slice %156 {offsets = [0, 8], sizes = [16, 8], strides = [1, 1]} : vector<16x16xf32> to vector<16x8xf32>
    %cst_69 = arith.constant 0.000000e+00 : f32
    %174 = vector.broadcast %cst_69 : f32 to vector<16x8xf32>
    %175 = arith.subf %174, %173 : vector<16x8xf32>
    %176 = tpu.concatenate %175, %172 in 1 : vector<16x8xf32>, vector<16x8xf32> -> vector<16x16xf32>
    %177 = arith.mulf %176, %4 : vector<16x16xf32>
    %178 = arith.addf %171, %177 : vector<16x16xf32>
    %179 = arith.truncf %178 : vector<16x16xf32> to vector<16x16xbf16>
    %180 = arith.truncf %157 : vector<16x16xf32> to vector<16x16xbf16>
    %181 = vector.extract_strided_slice %170 {offsets = [0, 0], sizes = [16, 16], strides = [1, 1]} : vector<16x32xbf16> to vector<16x16xbf16>
    %182 = tpu.transpose %179, [1, 0] : vector<16x16xbf16> -> vector<16x16xbf16>
    %cst_70 = arith.constant dense<0.000000e+00> : vector<16x16xf32>
    %183 = tpu.matmul %181, %182, %cst_70 {dimension_numbers = #tpu.dot_dimension_numbers<[1], [0], [0], [1], [0, 0, 1, 1], [], []>} : vector<16x16xbf16>, vector<16x16xbf16>, vector<16x16xf32> -> vector<16x16xf32>
    %cst_71 = arith.constant 2.500000e-01 : f32
    %184 = vector.broadcast %cst_71 : f32 to vector<16x16xf32>
    %185 = arith.mulf %183, %184 : vector<16x16xf32>
    %186 = arith.addf %185, %5 : vector<16x16xf32>
    %cst_72 = arith.constant dense<0xFF800000> : vector<16xf32>
    %187 = vector.multi_reduction <maximumf>, %186, %cst_72 [1] : vector<16x16xf32> to vector<16xf32>
    %188 = vector.shape_cast %187 : vector<16xf32> to vector<16x1xf32>
    %189 = vector.broadcast %188 : vector<16x1xf32> to vector<16x16xf32>
    %190 = arith.subf %186, %189 : vector<16x16xf32>
    %191 = math.exp %190 : vector<16x16xf32>
    %cst_73 = arith.constant dense<0.000000e+00> : vector<16xf32>
    %192 = vector.multi_reduction <add>, %191, %cst_73 [1] : vector<16x16xf32> to vector<16xf32>
    %193 = vector.shape_cast %192 : vector<16xf32> to vector<16x1xf32>
    %194 = tpu.reciprocal %193 {approx = true} : vector<16x1xf32> -> vector<16x1xf32>
    %195 = vector.broadcast %194 : vector<16x1xf32> to vector<16x16xf32>
    %196 = arith.mulf %191, %195 : vector<16x16xf32>
    %197 = arith.truncf %196 : vector<16x16xf32> to vector<16x16xbf16>
    %cst_74 = arith.constant dense<0.000000e+00> : vector<16x16xf32>
    %198 = tpu.matmul %197, %180, %cst_74 {dimension_numbers = #tpu.dot_dimension_numbers<[1], [0], [0], [1], [0, 0, 1, 1], [], []>} : vector<16x16xbf16>, vector<16x16xbf16>, vector<16x16xf32> -> vector<16x16xf32>
    %199 = vector.extract_strided_slice %170 {offsets = [0, 16], sizes = [16, 16], strides = [1, 1]} : vector<16x32xbf16> to vector<16x16xbf16>
    %200 = tpu.transpose %179, [1, 0] : vector<16x16xbf16> -> vector<16x16xbf16>
    %cst_75 = arith.constant dense<0.000000e+00> : vector<16x16xf32>
    %201 = tpu.matmul %199, %200, %cst_75 {dimension_numbers = #tpu.dot_dimension_numbers<[1], [0], [0], [1], [0, 0, 1, 1], [], []>} : vector<16x16xbf16>, vector<16x16xbf16>, vector<16x16xf32> -> vector<16x16xf32>
    %cst_76 = arith.constant 2.500000e-01 : f32
    %202 = vector.broadcast %cst_76 : f32 to vector<16x16xf32>
    %203 = arith.mulf %201, %202 : vector<16x16xf32>
    %204 = arith.addf %203, %5 : vector<16x16xf32>
    %cst_77 = arith.constant dense<0xFF800000> : vector<16xf32>
    %205 = vector.multi_reduction <maximumf>, %204, %cst_77 [1] : vector<16x16xf32> to vector<16xf32>
    %206 = vector.shape_cast %205 : vector<16xf32> to vector<16x1xf32>
    %207 = vector.broadcast %206 : vector<16x1xf32> to vector<16x16xf32>
    %208 = arith.subf %204, %207 : vector<16x16xf32>
    %209 = math.exp %208 : vector<16x16xf32>
    %cst_78 = arith.constant dense<0.000000e+00> : vector<16xf32>
    %210 = vector.multi_reduction <add>, %209, %cst_78 [1] : vector<16x16xf32> to vector<16xf32>
    %211 = vector.shape_cast %210 : vector<16xf32> to vector<16x1xf32>
    %212 = tpu.reciprocal %211 {approx = true} : vector<16x1xf32> -> vector<16x1xf32>
    %213 = vector.broadcast %212 : vector<16x1xf32> to vector<16x16xf32>
    %214 = arith.mulf %209, %213 : vector<16x16xf32>
    %215 = arith.truncf %214 : vector<16x16xf32> to vector<16x16xbf16>
    %cst_79 = arith.constant dense<0.000000e+00> : vector<16x16xf32>
    %216 = tpu.matmul %215, %180, %cst_79 {dimension_numbers = #tpu.dot_dimension_numbers<[1], [0], [0], [1], [0, 0, 1, 1], [], []>} : vector<16x16xbf16>, vector<16x16xbf16>, vector<16x16xf32> -> vector<16x16xf32>
    %217 = tpu.concatenate %198, %216 in 1 : vector<16x16xf32>, vector<16x16xf32> -> vector<16x32xf32>
    %218 = arith.truncf %217 : vector<16x32xf32> to vector<16x32xbf16>
    %c1_80 = arith.constant 1 : index
    %c0_81 = arith.constant 0 : index
    %c0_82 = arith.constant 0 : index
    %219 = vector.load %arg8[%c1_80, %c0_81, %c0_82] : memref<2x32x32xbf16, #tpu.memory_space<vmem>>, vector<1x32x32xbf16>
    %220 = vector.shape_cast %219 : vector<1x32x32xbf16> to vector<32x32xbf16>
    %cst_83 = arith.constant dense<0.000000e+00> : vector<16x32xf32>
    %221 = tpu.matmul %218, %220, %cst_83 {dimension_numbers = #tpu.dot_dimension_numbers<[1], [0], [0], [1], [0, 0, 1, 1], [], []>} : vector<16x32xbf16>, vector<32x32xbf16>, vector<16x32xf32> -> vector<16x32xf32>
    %222 = arith.addf %134, %221 : vector<16x32xf32>
    %c1_84 = arith.constant 1 : index
    %c0_85 = arith.constant 0 : index
    %c0_86 = arith.constant 0 : index
    %223 = vector.load %arg9[%c1_84, %c0_85, %c0_86] : memref<2x1x32xf32, #tpu.memory_space<vmem>>, vector<1x1x32xf32>
    %224 = vector.shape_cast %223 : vector<1x1x32xf32> to vector<1x32xf32>
    %225 = arith.mulf %222, %222 : vector<16x32xf32>
    %cst_87 = arith.constant dense<0.000000e+00> : vector<16xf32>
    %226 = vector.multi_reduction <add>, %225, %cst_87 [1] : vector<16x32xf32> to vector<16xf32>
    %227 = vector.shape_cast %226 : vector<16xf32> to vector<16x1xf32>
    %cst_88 = arith.constant 3.200000e+01 : f32
    %228 = vector.broadcast %cst_88 : f32 to vector<16x1xf32>
    %229 = arith.divf %227, %228 : vector<16x1xf32>
    %cst_89 = arith.constant 9.99999997E-7 : f32
    %230 = vector.broadcast %cst_89 : f32 to vector<16x1xf32>
    %231 = arith.addf %229, %230 : vector<16x1xf32>
    %232 = math.rsqrt %231 : vector<16x1xf32>
    %233 = vector.broadcast %232 : vector<16x1xf32> to vector<16x32xf32>
    %234 = arith.mulf %222, %233 : vector<16x32xf32>
    %cst_90 = arith.constant 1.000000e+00 : f32
    %235 = vector.broadcast %cst_90 : f32 to vector<1x32xf32>
    %236 = arith.addf %235, %224 : vector<1x32xf32>
    %237 = vector.broadcast %236 : vector<1x32xf32> to vector<16x32xf32>
    %238 = arith.mulf %234, %237 : vector<16x32xf32>
    %239 = arith.truncf %238 : vector<16x32xf32> to vector<16x32xbf16>
    %c1_91 = arith.constant 1 : index
    %c0_92 = arith.constant 0 : index
    %c0_93 = arith.constant 0 : index
    %240 = vector.load %arg10[%c1_91, %c0_92, %c0_93] : memref<2x32x128xbf16, #tpu.memory_space<vmem>>, vector<1x32x128xbf16>
    %241 = vector.shape_cast %240 : vector<1x32x128xbf16> to vector<32x128xbf16>
    %cst_94 = arith.constant dense<0.000000e+00> : vector<16x128xf32>
    %242 = tpu.matmul %239, %241, %cst_94 {dimension_numbers = #tpu.dot_dimension_numbers<[1], [0], [0], [1], [0, 0, 1, 1], [], []>} : vector<16x32xbf16>, vector<32x128xbf16>, vector<16x128xf32> -> vector<16x128xf32>
    %243 = vector.extract_strided_slice %242 {offsets = [0, 0], sizes = [16, 64], strides = [1, 1]} : vector<16x128xf32> to vector<16x64xf32>
    %244 = vector.extract_strided_slice %242 {offsets = [0, 64], sizes = [16, 64], strides = [1, 1]} : vector<16x128xf32> to vector<16x64xf32>
    %cst_95 = arith.constant 5.000000e-01 : f32
    %245 = vector.broadcast %cst_95 : f32 to vector<16x64xf32>
    %246 = arith.mulf %245, %243 : vector<16x64xf32>
    %cst_96 = arith.constant 4.471500e-02 : f32
    %247 = vector.broadcast %cst_96 : f32 to vector<16x64xf32>
    %248 = arith.mulf %247, %243 : vector<16x64xf32>
    %249 = arith.mulf %248, %243 : vector<16x64xf32>
    %250 = arith.mulf %249, %243 : vector<16x64xf32>
    %251 = arith.addf %243, %250 : vector<16x64xf32>
    %cst_97 = arith.constant 0.797884583 : f32
    %252 = vector.broadcast %cst_97 : f32 to vector<16x64xf32>
    %253 = arith.mulf %252, %251 : vector<16x64xf32>
    %254 = math.tanh %253 : vector<16x64xf32>
    %cst_98 = arith.constant 1.000000e+00 : f32
    %255 = vector.broadcast %cst_98 : f32 to vector<16x64xf32>
    %256 = arith.addf %255, %254 : vector<16x64xf32>
    %257 = arith.mulf %246, %256 : vector<16x64xf32>
    %258 = arith.mulf %257, %244 : vector<16x64xf32>
    %259 = arith.truncf %258 : vector<16x64xf32> to vector<16x64xbf16>
    %c1_99 = arith.constant 1 : index
    %c0_100 = arith.constant 0 : index
    %c0_101 = arith.constant 0 : index
    %260 = vector.load %arg11[%c1_99, %c0_100, %c0_101] : memref<2x64x32xbf16, #tpu.memory_space<vmem>>, vector<1x64x32xbf16>
    %261 = vector.shape_cast %260 : vector<1x64x32xbf16> to vector<64x32xbf16>
    %cst_102 = arith.constant dense<0.000000e+00> : vector<16x32xf32>
    %262 = tpu.matmul %259, %261, %cst_102 {dimension_numbers = #tpu.dot_dimension_numbers<[1], [0], [0], [1], [0, 0, 1, 1], [], []>} : vector<16x64xbf16>, vector<64x32xbf16>, vector<16x32xf32> -> vector<16x32xf32>
    %263 = arith.addf %222, %262 : vector<16x32xf32>
    %c0_103 = arith.constant 0 : index
    %c0_104 = arith.constant 0 : index
    %264 = vector.load %arg12[%c0_103, %c0_104] : memref<16x32xf32, #tpu.memory_space<vmem>>, vector<16x32xf32>
    tpu.vector_store %arg12[%c0_103, %c0_104], %263 {strides = array<i32>} : memref<16x32xf32, #tpu.memory_space<vmem>>, vector<16x32xf32>,
    return
  }
}

</mosaic_0001>

<bundles_post_ra>
// kernel: tile.11
= control target key start
LH: loop header
LB: loop body
LE: loop exit
PB: predicated region body
PF: predicated region fallthrough
CT: control target
= control target key end

     0   :  { %vm83_vm0 = vcmask 1047556   ;;  %vm85_vm1 = vcmask 130048   ;;  %vm104_vm2 = vcmask 261248   ;;  %s226_s0 = inlined_call_operand.vmem [shape: f32[16,2,16], index: 0, kind: input, shape index: {}]   ;;  %s227_s1 = inlined_call_operand.vmem [shape: f32[16,32], index: 1, kind: output, shape index: {}]  }
   0x1   :  { %v139_v0 = vld [vmem:[%s226_s0 + $0xe] sm:$0x3]  ;;  %v140_v1 = vld [vmem:[%s226_s0 + $0xc] sm:$0x3]  ;;  %v141_v2 = vld [vmem:[%s226_s0 + $0xa] sm:$0x3] }
   0x2   :  { %49 = vst [vmem:[#allocation0 + $0x38] sm:$0x3] %v139_v0  ;;  %54 = vst [vmem:[#allocation0 + $0x30] sm:$0x3] %v140_v1  ;;  %v142_v3 = vld [vmem:[%s226_s0 + $0x8] sm:$0x3] }
   0x3   :  { %59 = vst [vmem:[#allocation0 + $0x28] sm:$0x3] %v141_v2  ;;  %v143_v4 = vld [vmem:[%s226_s0 + $0x6] sm:$0x3]  ;;  %v144_v5 = vld [vmem:[%s226_s0 + $0x4] sm:$0x3] }
   0x4   :  { %64 = vst [vmem:[#allocation0 + $0x20] sm:$0x3] %v142_v3  ;;  %69 = vst [vmem:[#allocation0 + $0x18] sm:$0x3] %v143_v4  ;;  %v145_v6 = vld [vmem:[%s226_s0 + $0x2] sm:$0x3] }
   0x5   :  { %74 = vst [vmem:[#allocation0 + $0x10] sm:$0x3] %v144_v5  ;;  %v79_v7 = vld [vmem:[%s226_s0] sm:$0x3]  ;;  %78 = vst [vmem:[#allocation0 + $0x8] sm:$0x3] %v145_v6 }
   0x6   :  { %80 = vst [vmem:[#allocation0] sm:$0x3] %v79_v7  ;;  %v131_v8 = vld [vmem:[%s226_s0 + $0x1e] sm:$0x3]  ;;  %v132_v9 = vld [vmem:[%s226_s0 + $0x1c] sm:$0x3] }
   0x7   :  { %v133_v10 = vld [vmem:[%s226_s0 + $0x1a] sm:$0x3]  ;;  %9 = vst [vmem:[#allocation0 + $0x78] sm:$0x3] %v131_v8  ;;  %14 = vst [vmem:[#allocation0 + $0x70] sm:$0x3] %v132_v9 }
   0x8   :  { %19 = vst [vmem:[#allocation0 + $0x68] sm:$0x3] %v133_v10  ;;  %v134_v11 = vld [vmem:[%s226_s0 + $0x18] sm:$0x3]  ;;  %v135_v12 = vld [vmem:[%s226_s0 + $0x16] sm:$0x3] }
   0x9   :  { %v136_v13 = vld [vmem:[%s226_s0 + $0x14] sm:$0x3]  ;;  %24 = vst [vmem:[#allocation0 + $0x60] sm:$0x3] %v134_v11  ;;  %29 = vst [vmem:[#allocation0 + $0x58] sm:$0x3] %v135_v12 }
   0xa   :  { %34 = vst [vmem:[#allocation0 + $0x50] sm:$0x3] %v136_v13  ;;  %v137_v14 = vld [vmem:[%s226_s0 + $0x12] sm:$0x3]  ;;  %v138_v15 = vld [vmem:[%s226_s0 + $0x10] sm:$0x3] }
   0xb   :  { %39 = vst [vmem:[#allocation0 + $0x48] sm:$0x3] %v137_v14  ;;  %44 = vst [vmem:[#allocation0 + $0x40] sm:$0x3] %v138_v15  ;;  %s149_s0 = smov 16  }
   0xc   :  { %v99_v16 = vld [vmem:[#allocation0 + $0x1] ss:$8 sm:$0xf0]   ;;  %v82_v17 = vld [vmem:[#allocation0] ss:$8 sm:$0xf0]  }
   0xd   :  { %v97_v18 = vld [vmem:[#allocation0 + $0x1] ss:$8 sm:$0xf]   ;;  %v81_v19 = vld [vmem:[#allocation0] ss:$8 sm:$0xf]  }
   0xe   :  { %v101_v20 = vsel %vm83_vm0, %v99_v16, %v97_v18  ;;  %v84_v21 = vsel %vm83_vm0, %v82_v17, %v81_v19 }
   0xf   :  { %102 = vrot.lane.b32.xlu0 %v101_v20, %s149_s0  ;;  %86 = vst.msk [vmem:[%s227_s1] sm:$0xff] %vm85_vm1, %v84_v21  }
  0x10   :  { %v109_v22 = vld [vmem:[#allocation0 + $0x41] ss:$8 sm:$0xf0]   ;;  %v90_v23 = vld [vmem:[#allocation0 + $0x40] ss:$8 sm:$0xf0]  }
  0x12   :  { %v107_v24 = vld [vmem:[#allocation0 + $0x41] ss:$8 sm:$0xf]   ;;  %v88_v25 = vld [vmem:[#allocation0 + $0x40] ss:$8 sm:$0xf]  }
  0x13   :  { %v111_v26 = vsel %vm83_vm0, %v109_v22, %v107_v24  ;;  %v92_v27 = vsel %vm83_vm0, %v90_v23, %v88_v25 }
  0x14   :  { %146 = vst.msk [vmem:[%s227_s1 + $0x8] sm:$0xff] %vm85_vm1, %v92_v27   ;;  %112 = vrot.lane.b32.xlu0 %v111_v26, %s149_s0 }
  0x81   :  { %v103_v28 = vpop.permute.xlu0 %102  }
  0x82   :  { %105 = vst.msk [vmem:[%s227_s1] sm:$0xff] %vm104_vm2, %v103_v28  }
  0x86   :  { %v113_v29 = vpop.permute.xlu0 %112  }
  0x87   :  { %147 = vst.msk [vmem:[%s227_s1 + $0x8] sm:$0xff] %vm104_vm2, %v113_v29  }

// kernel: decoder_stack_forward.1
= control target key start
LH: loop header
LB: loop body
LE: loop exit
PB: predicated region body
PF: predicated region fallthrough
CT: control target
= control target key end

     0   :  { %vm58_vm0 = vcmask 261120   ;;  %s2232_s0 = inlined_call_operand.vmem [shape: f32[16,32], index: 0, kind: input, shape index: {}]   ;;  %s2233_s1 = inlined_call_operand.vmem [shape: f32[16,32], index: 1, kind: input, shape index: {}]   ;;  %s2234_s2 = inlined_call_operand.vmem [shape: f32[16,32], index: 2, kind: input, shape index: {}]   ;;  %s2235_s3 = inlined_call_operand.vmem [shape: f32[16,16], index: 3, kind: input, shape index: {}]   ;;  %s2236_s4 = inlined_call_operand.vmem [shape: f32[16,16], index: 4, kind: input, shape index: {}]   ;;  %s2237_s5 = inlined_call_operand.vmem [shape: f32[16,16], index: 5, kind: input, shape index: {}]   ;;  %s2238_s6 = inlined_call_operand.vmem [shape: f32[2,1,32], index: 6, kind: input, shape index: {}]   ;;  %s2239_s7 = inlined_call_operand.vmem [shape: bf16[2,32,64], index: 7, kind: input, shape index: {}]   ;;  %s2240_s8 = inlined_call_operand.vmem [shape: bf16[2,32,32], index: 8, kind: input, shape index: {}]   ;;  %s2241_s9 = inlined_call_operand.vmem [shape: f32[2,1,32], index: 9, kind: input, shape index: {}]   ;;  %s2242_s10 = inlined_call_operand.vmem [shape: bf16[2,32,128], index: 10, kind: input, shape index: {}]   ;;  %s2243_s11 = inlined_call_operand.vmem [shape: bf16[2,64,32], index: 11, kind: input, shape index: {}]   ;;  %s2244_s12 = inlined_call_operand.hbm [shape: f32[16,32], index: 12, kind: output, shape index: {}]  }
   0x1   :  { %v1835_v0 = vld [vmem:[%s2232_s0] sm:$0xff]  ;;  %v1840_v1 = vld [vmem:[%s2232_s0 + $0x8] sm:$0xff] }
   0x2   :  { %v56_v2 = vmul.f32 %v1835_v0, %v1835_v0  ;;  %v57_v3 = vmul.f32 %v1840_v1, %v1840_v1 }
   0x4   :  { %v59_v4 = vsel %vm58_vm0, %v56_v2, 0.0  ;;  %v62_v5 = vsel %vm58_vm0, %v57_v3, 0.0 }
   0x5   :  { %60 = vadd.xlane.f32.xlu0 %v59_v4 }
   0x9   :  { %63 = vadd.xlane.f32.xlu0 %v62_v5 }
   0xa   :  { %17 = vsyncpa [#allocation3], 0  ;;  %v1655_v6 = vld [vmem:[%s2239_s7 + $0x8] sm:$0xff]   ;;  %v1753_v7 = vmov 0.0   ;;  %vm1754_vm1 = vmmov 0   ;;  %v1656_v8 = vld [vmem:[%s2239_s7] sm:$0xff]   ;;  %v76_v15 = vlaneseq }
   0xb   :  { %1511 = vmatprep.subr.bf16.mxu1 %v1753_v7  ;;  %1515 = vmatprep.mubr.msk.bf16.mxu1 %vm1754_vm1, %v1753_v7  ;;  %v55_v17 = vld [vmem:[%s2238_s6] sm:$0x1]  ;;  %s1755_s30 = smov 104   ;;  %s1756_s13 = smov 88   ;;  %v50_v35 = vld [vmem:[%s2235_s3 + $0x8] sm:$0xff]  ;;  %vm164_vm2 = vcmask 64512  }
   0xc   :  { %1512 = vmatpush3.bf16.msra.mxu1 %v1655_v6  ;;  %1525 = vmatprep.subr.bf16.mxu0 %v1753_v7  ;;  %v77_v16 = vshrl.u32 %v76_v15, 7  ;;  %v74_v18 = vadd.f32 1.0, %v55_v17  ;;  %s1757_s14 = smov 120   ;;  %s1758_s15 = smov 8   ;;  %v49_v34 = vld [vmem:[%s2235_s3] sm:$0xff]  ;;  %v1907_v42 = vld [vmem:[%s2236_s4 + $0x8] sm:$0xff] }
   0xd   :  { %1513 = vmatprep.subr.bf16.mxu1 %v1753_v7  ;;  %1527 = vmatprep.mubr.msk.bf16.mxu0 %vm1754_vm1, %v1753_v7  ;;  %s1759_s18 = smov 32   ;;  %v1899_v36 = vld [vmem:[%s2236_s4] sm:$0xff]  ;;  %vm167_vm3 = vcmask 130048   ;;  %vm170_vm4 = vcmask 195584   ;;  %s1760_s3 = smov 96   ;;  %v1929_v60 = vld [vmem:[%s2234_s2 + $0x8] sm:$0xff] }
   0xe   :  { %v1865_v19 = vsub.s32 0, %v77_v16  ;;  %v1935_v63 = vld [vmem:[%s2233_s1 + $0x8] sm:$0xff]  ;;  %v1940_v2 = vld [vmem:[%s2233_s1] sm:$0xff]  ;;  %s1761_s1 = smov 112   ;;  %s1763_s4 = smov 16   ;;  %vm680_vm5 = vcmask 523264  }
   0xf   :  { %v1945_v3 = vld [vmem:[%s2234_s2] sm:$0xff]  ;;  %s1764_s24 = smov 64  }
  0x10   :  { %1514 = vmatpush3.bf16.msra.mxu1 %v1656_v8  ;;  %v79_v22 = vrot.slane %v74_v18, %v1865_v19 }
  0x11   :  { %1519 = vmatprep.subr.bf16.mxu1 %v1753_v7 }
  0x8e   :  { %v61_v9 = vpop.xlane.xlu0 %60 }
  0x8f   :  { %v66_v10 = vmul.f32 0.03125, %v61_v9 }
  0x91   :  { %v68_v11 = vadd.f32 1e-06, %v66_v10 }
  0x92   :  { %v64_v12 = vpop.xlane.xlu0 %63 }
  0x93   :  { %1675 = vrsqrt.f32 %v68_v11  ;;  %v67_v13 = vmul.f32 0.03125, %v64_v12 }
  0x95   :  { %v69_v14 = vadd.f32 1e-06, %v67_v13 }
  0x97   :  { %1677 = vrsqrt.f32 %v69_v14 }
  0xa0   :  { %v1676_v20 = vpop.eup %1675 }
  0xa1   :  { %v72_v21 = vmul.f32 %v1676_v20, %v1835_v0  ;;  %v1969_v20 = vld [vmem:[%s2237_s5] sm:$0xff] }
  0xa3   :  { %v81_v25 = vmul.f32 %v79_v22, %v72_v21 }
  0xa4   :  { %v1678_v23 = vpop.eup %1677 }
  0xa5   :  { %v73_v24 = vmul.f32 %v1678_v23, %v1840_v1 }
  0xa7   :  { %v82_v26 = vmul.f32 %v79_v22, %v73_v24 }
  0xa9   :  { %v83_v27 = vpack.c.bf16 %v82_v26, %v81_v25  ;;  %v1975_v25 = vld [vmem:[%s2237_s5 + $0x8] sm:$0xff]  ;;  %s1762_s5 = smov 80  }
  0xab   :  { %1516 = vmatmul.mubr.msk.bf16.vlgmr.msra.gmra.mxu1 %vm58_vm0, %v83_v27 }
  0xac   :  { %1521 = vmatprep.mubr.msk.bf16.mxu1 %vm1754_vm1, %v1753_v7 }
 0x16b   :  { %v1873_v28 = vpop.f32.mrf.mxu1 }
 0x16c   :  { %194 = vrot.lane.b32.xlu0 %v1873_v28, %s1755_s30  ;;  %v146_v29 = vsub.f32 0.0, %v1873_v28  ;;  %v144_v10 = vmul.f32 %v1873_v28, %v1940_v2 }
 0x16d   :  { %v1517_v30 = vpop.f32.mrf.mxu1 }
 0x16e   :  { %188 = vrot.lane.b32.xlu1 %v146_v29, %s1756_s13 }
 0x16f   :  { %v1879_v31 = vpop.f32.mrf.mxu1 }
 0x170   :  { %v147_v32 = vsub.f32 0.0, %v1879_v31  ;;  %v145_v9 = vmul.f32 %v1879_v31, %v1935_v63 }
 0x171   :  { %v1518_v33 = vpop.f32.mrf.mxu1 }
 0x172   :  { %152 = vrot.lane.b32.xlu0 %v147_v32, %s1757_s14  ;;  %190 = vrot.lane.b32.xlu1 %v147_v32, %s1756_s13 }
 0x176   :  { %160 = vrot.lane.b32.xlu0 %v1879_v31, %s1758_s15  ;;  %196 = vrot.lane.b32.xlu1 %v1879_v31, %s1755_s30 }
 0x17a   :  { %180 = vrot.lane.b32.xlu1 %v49_v34, %s1759_s18 }
 0x17e   :  { %182 = vrot.lane.b32.xlu1 %v50_v35, %s1759_s18 }
 0x1de   :  { %v195_v37 = vpop.permute.xlu0 %194 }
 0x1e0   :  { %v189_v38 = vpop.permute.xlu1 %188 }
 0x1e1   :  { %v200_v39 = vsel %vm164_vm2, %v189_v38, %v195_v37 }
 0x1e2   :  { %v202_v40 = vmul.f32 %v200_v39, %v1899_v36 }
 0x1e4   :  { %206 = vrot.lane.b32.xlu1 %v202_v40, %s1759_s18  ;;  %v191_v41 = vpop.permute.xlu1 %190  ;;  %v153_v47 = vpop.permute.xlu0 %152 }
 0x1e8   :  { %v197_v43 = vpop.permute.xlu1 %196  ;;  %v161_v50 = vpop.permute.xlu0 %160 }
 0x1e9   :  { %v201_v44 = vsel %vm164_vm2, %v191_v41, %v197_v43  ;;  %v166_v54 = vsel %vm164_vm2, %v153_v47, %v161_v50 }
 0x1ea   :  { %v203_v45 = vmul.f32 %v201_v44, %v1907_v42  ;;  %v169_v58 = vsel %vm167_vm3, %v166_v54, %v153_v47 }
 0x1eb   :  { %v172_v61 = vsel %vm170_vm4, %v169_v58, %v161_v50 }
 0x1ec   :  { %208 = vrot.lane.b32.xlu1 %v203_v45, %s1759_s18  ;;  %v1915_v46 = vpop.permute.xlu1 %180  ;;  %v174_v5 = vmul.f32 %v172_v61, %v1929_v60 }
 0x1ed   :  { %v186_v51 = vmul.f32 %v1915_v46, %v1873_v28 }
 0x1ee   :  { %v176_v12 = vadd.f32 %v174_v5, %v145_v9 }
 0x1f0   :  { %150 = vrot.lane.b32.xlu1 %v146_v29, %s1757_s14  ;;  %v1917_v48 = vpop.permute.xlu1 %182 }
 0x1f1   :  { %v187_v52 = vmul.f32 %v1917_v48, %v1879_v31 }
 0x1f4   :  { %158 = vrot.lane.b32.xlu1 %v1873_v28, %s1758_s15 }
 0x256   :  { %v207_v49 = vpop.permute.xlu1 %206 }
 0x257   :  { %v212_v55 = vadd.f32 %v207_v49, %v186_v51 }
 0x25e   :  { %v209_v53 = vpop.permute.xlu1 %208 }
 0x25f   :  { %v213_v56 = vadd.f32 %v209_v53, %v187_v52 }
 0x261   :  { %v214_v57 = vpack.c.bf16 %v213_v56, %v212_v55 }
 0x262   :  { %v151_v59 = vpop.permute.xlu1 %150 }
 0x263   :  { %217 = vrot.lane.b32.xlu1 %v214_v57, %s1760_s3 }
 0x266   :  { %v159_v62 = vpop.permute.xlu1 %158 }
 0x267   :  { %v165_v4 = vsel %vm164_vm2, %v151_v59, %v159_v62 }
 0x268   :  { %v168_v6 = vsel %vm167_vm3, %v165_v4, %v151_v59 }
 0x269   :  { %v171_v8 = vsel %vm170_vm4, %v168_v6, %v159_v62 }
 0x26a   :  { %v173_v11 = vmul.f32 %v171_v8, %v1945_v3 }
 0x26c   :  { %v175_v13 = vadd.f32 %v173_v11, %v144_v10  ;;  %v215_v10 = vpack.c.bf16 %v1879_v31, %v1873_v28 }
 0x26e   :  { %v177_v14 = vpack.c.bf16 %v176_v12, %v175_v13 }
 0x270   :  { %342 = vrot.lane.b32.xlu0 %v177_v14, %s1761_s1 }
 0x2d5   :  { %v218_v15 = vpop.permute.xlu1 %217 }
 0x2d6   :  { %v223_v16 = vsel %vm167_vm3, %v218_v15, 0 }
 0x2d7   :  { %1520 = vmatpush3.bf16.xpose.msra.mxu1 %v223_v16 }
 0x2d8   :  { %1531 = vmatprep.subr.bf16.mxu1 %v1753_v7 }
 0x2de   :  { %1522 = vmatmul.mubr.msk.bf16.vlgmr.msra.gmra.mxu1 %vm167_vm3, %v177_v14 }
 0x2df   :  { %1532 = vmatpush3.bf16.xpose.msra.mxu1 %v223_v16  ;;  %1533 = vmatprep.mubr.msk.bf16.mxu1 %vm1754_vm1, %v1753_v7 }
 0x2e0   :  { %1543 = vmatprep.subr.bf16.mxu1 %v1753_v7 }
 0x2e2   :  { %v343_v17 = vpop.permute.xlu0 %342 }
 0x2e6   :  { %1534 = vmatmul.mubr.msk.bf16.vlgmr.msra.gmra.mxu1 %vm167_vm3, %v343_v17 }
 0x2e7   :  { %1547 = vmatprep.mubr.msk.bf16.mxu1 %vm1754_vm1, %v1753_v7 }
 0x39e   :  { %v259_v18 = vpop.f32.mrf.mxu1 }
 0x39f   :  { %v266_v21 = vmul.f32 0.25, %v259_v18 }
 0x3a0   :  { %v1523_v22 = vpop.f32.mrf.mxu1 }
 0x3a1   :  { %v268_v23 = vadd.f32 %v266_v21, %v1969_v20 }
 0x3a2   :  { %v262_v24 = vpop.f32.mrf.mxu1 }
 0x3a3   :  { %v267_v26 = vmul.f32 0.25, %v262_v24  ;;  %v270_v27 = vsel %vm167_vm3, %v268_v23, -inf }
 0x3a4   :  { %271 = vmax.xlane.f32.xlu1 %v270_v27  ;;  %v1524_v29 = vpop.f32.mrf.mxu1  ;;  %v1657_v27 = vld [vmem:[%s2240_s8 + $0x8] sm:$0xff]  }
 0x3a5   :  { %v269_v30 = vadd.f32 %v267_v26, %v1975_v25  ;;  %1544 = vmatpush3.bf16.msra.mxu1 %v1657_v27 }
 0x3a6   :  { %v381_v32 = vpop.f32.mrf.mxu1  ;;  %1545 = vmatprep.subr.bf16.mxu1 %v1753_v7 }
 0x3a7   :  { %v388_v33 = vmul.f32 0.25, %v381_v32  ;;  %v273_v34 = vsel %vm167_vm3, %v269_v30, -inf  ;;  %v1658_v32 = vld [vmem:[%s2240_s8] sm:$0xff]  }
 0x3a8   :  { %274 = vmax.xlane.f32.xlu0 %v273_v34  ;;  %v1535_v35 = vpop.f32.mrf.mxu1 }
 0x3a9   :  { %v390_v37 = vadd.f32 %v388_v33, %v1969_v20  ;;  %1546 = vmatpush3.bf16.msra.mxu1 %v1658_v32 }
 0x3aa   :  { %v384_v38 = vpop.f32.mrf.mxu1  ;;  %1559 = vmatprep.subr.bf16.mxu1 %v1753_v7 }
 0x3ab   :  { %v389_v39 = vmul.f32 0.25, %v384_v38  ;;  %v392_v40 = vsel %vm167_vm3, %v390_v37, -inf }
 0x3ac   :  { %393 = vmax.xlane.f32.xlu0 %v392_v40  ;;  %v1536_v41 = vpop.f32.mrf.mxu1 }
 0x3ad   :  { %v391_v43 = vadd.f32 %v389_v39, %v1975_v25 }
 0x3af   :  { %v395_v44 = vsel %vm167_vm3, %v391_v43, -inf }
 0x3b0   :  { %396 = vmax.xlane.f32.xlu1 %v395_v44 }
 0x42d   :  { %v272_v45 = vpop.xlane.xlu1 %271 }
 0x42e   :  { %v276_v47 = vsub.f32 %v268_v23, %v272_v45 }
 0x430   :  { %v278_v49 = vmul.f32 1.442695, %v276_v47 }
 0x431   :  { %v275_v50 = vpop.xlane.xlu0 %274 }
 0x432   :  { %1679 = vpow2.f32 %v278_v49  ;;  %v277_v51 = vsub.f32 %v269_v30, %v275_v50 }
 0x434   :  { %v280_v52 = vmul.f32 1.442695, %v277_v51 }
 0x435   :  { %v394_v53 = vpop.xlane.xlu0 %393 }
 0x436   :  { %1681 = vpow2.f32 %v280_v52  ;;  %v398_v54 = vsub.f32 %v390_v37, %v394_v53 }
 0x438   :  { %v400_v55 = vmul.f32 1.442695, %v398_v54 }
 0x439   :  { %v397_v56 = vpop.xlane.xlu1 %396 }
 0x43a   :  { %1683 = vpow2.f32 %v400_v55  ;;  %v399_v57 = vsub.f32 %v391_v43, %v397_v56 }
 0x43c   :  { %v402_v58 = vmul.f32 1.442695, %v399_v57 }
 0x43e   :  { %1685 = vpow2.f32 %v402_v58 }
 0x43f   :  { %v1680_v59 = vpop.eup %1679 }
 0x440   :  { %v282_v61 = vsel %vm167_vm3, %v1680_v59, 0.0 }
 0x441   :  { %283 = vadd.xlane.f32.xlu0 %v282_v61 }
 0x443   :  { %v1682_v62 = vpop.eup %1681 }
 0x444   :  { %v285_v4 = vsel %vm167_vm3, %v1682_v62, 0.0 }
 0x445   :  { %286 = vadd.xlane.f32.xlu1 %v285_v4 }
 0x447   :  { %v1684_v5 = vpop.eup %1683 }
 0x448   :  { %v404_v6 = vsel %vm167_vm3, %v1684_v5, 0.0 }
 0x449   :  { %405 = vadd.xlane.f32.xlu0 %v404_v6 }
 0x44b   :  { %v1686_v8 = vpop.eup %1685 }
 0x44c   :  { %v407_v9 = vsel %vm167_vm3, %v1686_v8, 0.0 }
 0x44d   :  { %408 = vadd.xlane.f32.xlu1 %v407_v9  ;;  %v532_v9 = vld [vmem:[%s2241_s9] sm:$0x1] }
 0x45f   :  { %294 = vrot.lane.b32.xlu0 %v215_v10, %s1762_s5  ;;  %v549_v10 = vadd.f32 1.0, %v532_v9 }
 0x4ca   :  { %v284_v11 = vpop.xlane.xlu0 %283 }
 0x4cb   :  { %1687 = vrcp.f32 %v284_v11 }
 0x4ce   :  { %v287_v12 = vpop.xlane.xlu1 %286 }
 0x4cf   :  { %1689 = vrcp.f32 %v287_v12 }
 0x4d2   :  { %v406_v13 = vpop.xlane.xlu0 %405 }
 0x4d3   :  { %1691 = vrcp.f32 %v406_v13  ;;  %v554_v13 = vrot.slane %v549_v10, %v1865_v19 }
 0x4d6   :  { %v295_v14 = vpop.permute.xlu0 %294  ;;  %v409_v15 = vpop.xlane.xlu1 %408 }
 0x4d7   :  { %1693 = vrcp.f32 %v409_v15  ;;  %1526 = vmatpush3.bf16.msra.mxu0 %v295_v14 }
 0x4d8   :  { %1537 = vmatprep.subr.bf16.mxu0 %v1753_v7  ;;  %v1688_v16 = vpop.eup %1687 }
 0x4d9   :  { %v290_v18 = vmul.f32 %v1688_v16, %v1680_v59 }
 0x4dc   :  { %v1690_v17 = vpop.eup %1689 }
 0x4dd   :  { %v291_v21 = vmul.f32 %v1690_v17, %v1682_v62 }
 0x4df   :  { %v292_v28 = vpack.c.bf16 %v291_v21, %v290_v18  ;;  %v1661_v21 = vld [vmem:[%s2243_s11 + $0x18] sm:$0xff]  }
 0x4e0   :  { %v1692_v31 = vpop.eup %1691 }
 0x4e1   :  { %1528 = vmatmul.mubr.msk.bf16.vlgmr.msra.gmra.mxu0 %vm167_vm3, %v292_v28  ;;  %v412_v23 = vmul.f32 %v1692_v31, %v1684_v5  ;;  %v1662_v28 = vld [vmem:[%s2243_s11 + $0x10] sm:$0xff]   ;;  %v1663_v31 = vld [vmem:[%s2243_s11 + $0x8] sm:$0xff]  }
 0x4e2   :  { %1538 = vmatpush3.bf16.msra.mxu0 %v295_v14  ;;  %1539 = vmatprep.mubr.msk.bf16.mxu0 %vm1754_vm1, %v1753_v7 }
 0x4e3   :  { %1551 = vmatprep.subr.bf16.mxu0 %v1753_v7 }
 0x4e4   :  { %v1694_v22 = vpop.eup %1693 }
 0x4e5   :  { %v413_v24 = vmul.f32 %v1694_v22, %v1686_v8  ;;  %v1664_v22 = vld [vmem:[%s2243_s11] sm:$0xff]  }
 0x4e7   :  { %v414_v26 = vpack.c.bf16 %v413_v24, %v412_v23 }
 0x4e9   :  { %1540 = vmatmul.mubr.msk.bf16.vlgmr.msra.gmra.mxu0 %vm167_vm3, %v414_v26 }
 0x4ea   :  { %1555 = vmatprep.mubr.msk.bf16.mxu0 %vm1754_vm1, %v1753_v7 }
 0x5a1   :  { %v334_v29 = vpop.f32.mrf.mxu0 }
 0x5a3   :  { %v1529_v30 = vpop.f32.mrf.mxu0 }
 0x5a5   :  { %v337_v33 = vpop.f32.mrf.mxu0 }
 0x5a7   :  { %v1530_v34 = vpop.f32.mrf.mxu0 }
 0x5a9   :  { %v452_v35 = vpop.f32.mrf.mxu0 }
 0x5ab   :  { %v1541_v37 = vpop.f32.mrf.mxu0 }
 0x5ad   :  { %v455_v38 = vpop.f32.mrf.mxu0 }
 0x5ae   :  { %v1645_v39 = vpack.i.bf16 %v455_v38, %v452_v35 }
 0x5af   :  { %v1542_v40 = vpop.f32.mrf.mxu0 }
 0x5b0   :  { %1646 = vrot.lane.b32.xlu1 %v1645_v39, %s1763_s4 }
 0x622   :  { %v1647_v41 = vpop.permute.xlu1 %1646 }
 0x623   :  { %v1649_v43 = vunpack.i.h.bf16 %v1647_v41  ;;  %v1648_v44 = vunpack.i.l.bf16 %v1647_v41 }
 0x625   :  { %v468_v45 = vsel %vm167_vm3, %v337_v33, %v1649_v43  ;;  %v467_v47 = vsel %vm167_vm3, %v334_v29, %v1648_v44 }
 0x626   :  { %v469_v49 = vpack.c.bf16 %v468_v45, %v467_v47 }
 0x628   :  { %1548 = vmatmul.mubr.msk.bf16.vlgmr.msra.gmra.mxu1 %vm58_vm0, %v469_v49 }
 0x629   :  { %1567 = vmatprep.mubr.msk.bf16.mxu1 %vm1754_vm1, %v1753_v7  ;;  %1560 = vmatpush3.bf16.msra.mxu1 %v1661_v21 }
 0x62a   :  { %1561 = vmatprep.subr.bf16.mxu1 %v1753_v7 }
 0x62d   :  { %1562 = vmatpush3.bf16.msra.mxu1 %v1662_v28 }
 0x62e   :  { %1563 = vmatprep.subr.bf16.mxu1 %v1753_v7 }
 0x631   :  { %1564 = vmatpush3.bf16.msra.mxu1 %v1663_v31 }
 0x632   :  { %1565 = vmatprep.subr.bf16.mxu1 %v1753_v7 }
 0x635   :  { %1566 = vmatpush3.bf16.msra.mxu1 %v1664_v22 }
 0x636   :  { %1585 = vmatprep.subr.bf16.mxu1 %v1753_v7 }
 0x6e8   :  { %v523_v50 = vpop.f32.mrf.mxu1 }
 0x6e9   :  { %v2014_v51 = vadd.f32 %v523_v50, %v1835_v0  ;;  %v1659_v0 = vld [vmem:[%s2242_s10 + $0x8] sm:$0xff]  }
 0x6ea   :  { %v1549_v52 = vpop.f32.mrf.mxu1  ;;  %1552 = vmatpush3.bf16.msra.mxu0 %v1659_v0 }
 0x6eb   :  { %v533_v53 = vmul.f32 %v2014_v51, %v2014_v51  ;;  %1553 = vmatprep.subr.bf16.mxu0 %v1753_v7 }
 0x6ec   :  { %v526_v54 = vpop.f32.mrf.mxu1 }
 0x6ed   :  { %v2019_v55 = vadd.f32 %v526_v54, %v1840_v1  ;;  %v535_v56 = vsel %vm58_vm0, %v533_v53, 0.0  ;;  %v1660_v1 = vld [vmem:[%s2242_s10] sm:$0xff]  }
 0x6ee   :  { %536 = vadd.xlane.f32.xlu1 %v535_v56  ;;  %v1550_v57 = vpop.f32.mrf.mxu1  ;;  %1554 = vmatpush3.bf16.msra.mxu0 %v1660_v1 }
 0x6ef   :  { %v534_v58 = vmul.f32 %v2019_v55, %v2019_v55  ;;  %1571 = vmatprep.subr.bf16.mxu0 %v1753_v7 }
 0x6f1   :  { %v538_v59 = vsel %vm58_vm0, %v534_v58, 0.0 }
 0x6f2   :  { %539 = vadd.xlane.f32.xlu0 %v538_v59 }
 0x777   :  { %v537_v61 = vpop.xlane.xlu1 %536 }
 0x778   :  { %v541_v62 = vmul.f32 0.03125, %v537_v61 }
 0x77a   :  { %v543_v4 = vadd.f32 1e-06, %v541_v62 }
 0x77b   :  { %v540_v5 = vpop.xlane.xlu0 %539 }
 0x77c   :  { %1695 = vrsqrt.f32 %v543_v4  ;;  %v542_v6 = vmul.f32 0.03125, %v540_v5 }
 0x77e   :  { %v544_v8 = vadd.f32 1e-06, %v542_v6 }
 0x780   :  { %1697 = vrsqrt.f32 %v544_v8 }
 0x789   :  { %v1696_v11 = vpop.eup %1695 }
 0x78a   :  { %v547_v12 = vmul.f32 %v1696_v11, %v2014_v51 }
 0x78c   :  { %v556_v16 = vmul.f32 %v554_v13, %v547_v12 }
 0x78d   :  { %v1698_v14 = vpop.eup %1697 }
 0x78e   :  { %v548_v15 = vmul.f32 %v1698_v14, %v2019_v55 }
 0x790   :  { %v557_v17 = vmul.f32 %v554_v13, %v548_v15 }
 0x792   :  { %v558_v18 = vpack.c.bf16 %v557_v17, %v556_v16  ;;  %v1427_v16 = vld [vmem:[%s2238_s6 + $0x1] sm:$0x1] }
 0x793   :  { %v745_v17 = vadd.f32 1.0, %v1427_v16 }
 0x794   :  { %1556 = vmatmul.mubr.msk.bf16.vlgmr.msra.gmra.mxu0 %vm58_vm0, %v558_v18 }
 0x795   :  { %1575 = vmatprep.mubr.msk.bf16.mxu0 %vm1754_vm1, %v1753_v7  ;;  %v750_v28 = vrot.slane %v745_v17, %v1865_v19 }
 0x854   :  { %v612_v23 = vpop.f32.mrf.mxu0 }
 0x855   :  { %639 = vrot.lane.b32.xlu0 %v612_v23, %s1764_s24  ;;  %v621_v29 = vmul.f32 0.044715, %v612_v23  ;;  %v619_v47 = vmul.f32 0.5, %v612_v23 }
 0x856   :  { %v1557_v24 = vpop.f32.mrf.mxu0 }
 0x857   :  { %v623_v32 = vmul.f32 %v621_v29, %v612_v23 }
 0x858   :  { %v615_v26 = vpop.f32.mrf.mxu0 }
 0x859   :  { %641 = vrot.lane.b32.xlu1 %v615_v26, %s1764_s24  ;;  %v622_v30 = vmul.f32 0.044715, %v615_v26  ;;  %v625_v34 = vmul.f32 %v623_v32, %v612_v23  ;;  %v620_v49 = vmul.f32 0.5, %v615_v26 }
 0x85a   :  { %v1558_v27 = vpop.f32.mrf.mxu0 }
 0x85b   :  { %v624_v33 = vmul.f32 %v622_v30, %v615_v26  ;;  %v627_v37 = vadd.f32 %v625_v34, %v612_v23 }
 0x85d   :  { %v626_v35 = vmul.f32 %v624_v33, %v615_v26  ;;  %v629_v39 = vmul.f32 0.7978846, %v627_v37 }
 0x85f   :  { %v628_v38 = vadd.f32 %v626_v35, %v615_v26  ;;  %1699 = vtanh.f32 %v629_v39 }
 0x861   :  { %v630_v40 = vmul.f32 0.7978846, %v628_v38 }
 0x863   :  { %1701 = vtanh.f32 %v630_v40 }
 0x86c   :  { %v1700_v41 = vpop.eup %1699 }
 0x86d   :  { %v633_v44 = vadd.f32 1.0, %v1700_v41 }
 0x86f   :  { %v635_v52 = vmul.f32 %v633_v44, %v619_v47 }
 0x870   :  { %v1702_v43 = vpop.eup %1701 }
 0x871   :  { %v634_v45 = vadd.f32 1.0, %v1702_v43 }
 0x873   :  { %v636_v53 = vmul.f32 %v634_v45, %v620_v49 }
 0x8c7   :  { %v640_v50 = vpop.permute.xlu0 %639 }
 0x8c8   :  { %v645_v56 = vmul.f32 %v640_v50, %v635_v52 }
 0x8cb   :  { %v642_v54 = vpop.permute.xlu1 %641 }
 0x8cc   :  { %v646_v57 = vmul.f32 %v642_v54, %v636_v53 }
 0x8ce   :  { %v647_v58 = vpack.c.bf16 %v646_v57, %v645_v56 }
 0x8d0   :  { %1568 = vmatmul.mubr.msk.bf16.vlgmr.msra.gmra.mxu1 %vm680_vm5, %v647_v58 }
 0x8d1   :  { %1587 = vmatprep.mubr.msk.bf16.mxu1 %vm1754_vm1, %v1753_v7 }
 0x990   :  { %v718_v59 = vpop.f32.mrf.mxu1 }
 0x991   :  { %v2064_v0 = vadd.f32 %v718_v59, %v2014_v51  ;;  %v1665_v51 = vld [vmem:[%s2239_s7 + $0x18] sm:$0xff]  }
 0x992   :  { %v1569_v1 = vpop.f32.mrf.mxu1  ;;  %1572 = vmatpush3.bf16.msra.mxu0 %v1665_v51 }
 0x993   :  { %v729_v61 = vmul.f32 %v2064_v0, %v2064_v0  ;;  %1573 = vmatprep.subr.bf16.mxu0 %v1753_v7 }
 0x994   :  { %v721_v62 = vpop.f32.mrf.mxu1 }
 0x995   :  { %v2069_v4 = vadd.f32 %v721_v62, %v2019_v55  ;;  %v731_v5 = vsel %vm58_vm0, %v729_v61, 0.0  ;;  %v1666_v55 = vld [vmem:[%s2239_s7 + $0x10] sm:$0xff]  }
 0x996   :  { %732 = vadd.xlane.f32.xlu1 %v731_v5  ;;  %v1570_v6 = vpop.f32.mrf.mxu1  ;;  %1574 = vmatpush3.bf16.msra.mxu0 %v1666_v55 }
 0x997   :  { %v730_v8 = vmul.f32 %v2069_v4, %v2069_v4  ;;  %1579 = vmatprep.subr.bf16.mxu0 %v1753_v7 }
 0x999   :  { %v734_v9 = vsel %vm58_vm0, %v730_v8, 0.0 }
 0x99a   :  { %735 = vadd.xlane.f32.xlu0 %v734_v9 }
 0xa1f   :  { %v733_v10 = vpop.xlane.xlu1 %732 }
 0xa20   :  { %v737_v11 = vmul.f32 0.03125, %v733_v10 }
 0xa22   :  { %v739_v12 = vadd.f32 1e-06, %v737_v11 }
 0xa23   :  { %v736_v13 = vpop.xlane.xlu0 %735 }
 0xa24   :  { %1703 = vrsqrt.f32 %v739_v12  ;;  %v738_v14 = vmul.f32 0.03125, %v736_v13 }
 0xa26   :  { %v740_v15 = vadd.f32 1e-06, %v738_v14 }
 0xa28   :  { %1705 = vrsqrt.f32 %v740_v15 }
 0xa31   :  { %v1704_v18 = vpop.eup %1703 }
 0xa32   :  { %v743_v21 = vmul.f32 %v1704_v18, %v2064_v0 }
 0xa34   :  { %v752_v23 = vmul.f32 %v750_v28, %v743_v21 }
 0xa35   :  { %v1706_v31 = vpop.eup %1705 }
 0xa36   :  { %v744_v22 = vmul.f32 %v1706_v31, %v2069_v4 }
 0xa38   :  { %v753_v24 = vmul.f32 %v750_v28, %v744_v22 }
 0xa3a   :  { %v754_v26 = vpack.c.bf16 %v753_v24, %v752_v23 }
 0xa3c   :  { %1576 = vmatmul.mubr.msk.bf16.vlgmr.msra.gmra.mxu0 %vm58_vm0, %v754_v26 }
 0xa3d   :  { %1581 = vmatprep.mubr.msk.bf16.mxu0 %vm1754_vm1, %v1753_v7 }
 0xafc   :  { %v2092_v27 = vpop.f32.mrf.mxu0 }
 0xafd   :  { %v818_v29 = vsub.f32 0.0, %v2092_v27  ;;  %v847_v47 = vmul.f32 %v2092_v27, %v1915_v46  ;;  %v816_v6 = vmul.f32 %v2092_v27, %v1940_v2 }
 0xafe   :  { %v1577_v30 = vpop.f32.mrf.mxu0 }
 0xaff   :  { %849 = vrot.lane.b32.xlu0 %v818_v29, %s1756_s13 }
 0xb00   :  { %v2096_v32 = vpop.f32.mrf.mxu0 }
 0xb01   :  { %v819_v33 = vsub.f32 0.0, %v2096_v32  ;;  %v848_v45 = vmul.f32 %v2096_v32, %v1917_v48  ;;  %v817_v5 = vmul.f32 %v2096_v32, %v1935_v63 }
 0xb02   :  { %v1578_v34 = vpop.f32.mrf.mxu0 }
 0xb03   :  { %857 = vrot.lane.b32.xlu0 %v2096_v32, %s1755_s30  ;;  %851 = vrot.lane.b32.xlu1 %v819_v33, %s1756_s13 }
 0xb07   :  { %855 = vrot.lane.b32.xlu1 %v2092_v27, %s1755_s30 }
 0xb71   :  { %v850_v35 = vpop.permute.xlu0 %849 }
 0xb75   :  { %v858_v37 = vpop.permute.xlu0 %857  ;;  %v852_v38 = vpop.permute.xlu1 %851 }
 0xb76   :  { %v862_v39 = vsel %vm164_vm2, %v852_v38, %v858_v37 }
 0xb77   :  { %v864_v40 = vmul.f32 %v862_v39, %v1907_v42 }
 0xb79   :  { %869 = vrot.lane.b32.xlu0 %v864_v40, %s1759_s18  ;;  %v856_v41 = vpop.permute.xlu1 %855 }
 0xb7a   :  { %v861_v43 = vsel %vm164_vm2, %v850_v35, %v856_v41 }
 0xb7b   :  { %v863_v44 = vmul.f32 %v861_v43, %v1899_v36 }
 0xb7d   :  { %824 = vrot.lane.b32.xlu0 %v819_v33, %s1757_s14  ;;  %867 = vrot.lane.b32.xlu1 %v863_v44, %s1759_s18 }
 0xb81   :  { %832 = vrot.lane.b32.xlu0 %v2096_v32, %s1758_s15  ;;  %822 = vrot.lane.b32.xlu1 %v818_v29, %s1757_s14 }
 0xb85   :  { %830 = vrot.lane.b32.xlu1 %v2092_v27, %s1758_s15 }
 0xbeb   :  { %v870_v42 = vpop.permute.xlu0 %869 }
 0xbec   :  { %v874_v50 = vadd.f32 %v870_v42, %v848_v45 }
 0xbef   :  { %v825_v36 = vpop.permute.xlu0 %824  ;;  %v868_v49 = vpop.permute.xlu1 %867 }
 0xbf0   :  { %v873_v52 = vadd.f32 %v868_v49, %v847_v47 }
 0xbf2   :  { %v875_v53 = vpack.c.bf16 %v874_v50, %v873_v52 }
 0xbf3   :  { %v833_v54 = vpop.permute.xlu0 %832  ;;  %v823_v56 = vpop.permute.xlu1 %822 }
 0xbf4   :  { %v837_v57 = vsel %vm164_vm2, %v825_v36, %v833_v54  ;;  %878 = vrot.lane.b32.xlu1 %v875_v53, %s1760_s3 }
 0xbf5   :  { %v839_v58 = vsel %vm167_vm3, %v837_v57, %v825_v36 }
 0xbf6   :  { %v841_v59 = vsel %vm170_vm4, %v839_v58, %v833_v54 }
 0xbf7   :  { %v831_v1 = vpop.permute.xlu1 %830  ;;  %v843_v46 = vmul.f32 %v841_v59, %v1929_v60 }
 0xbf8   :  { %v836_v48 = vsel %vm164_vm2, %v823_v56, %v831_v1 }
 0xbf9   :  { %v838_v61 = vsel %vm167_vm3, %v836_v48, %v823_v56  ;;  %v845_v9 = vadd.f32 %v843_v46, %v817_v5  ;;  %v876_v56 = vpack.c.bf16 %v2096_v32, %v2092_v27 }
 0xbfa   :  { %v840_v62 = vsel %vm170_vm4, %v838_v61, %v831_v1 }
 0xbfb   :  { %v842_v8 = vmul.f32 %v840_v62, %v1945_v3 }
 0xbfd   :  { %v844_v51 = vadd.f32 %v842_v8, %v816_v6 }
 0xbff   :  { %v846_v55 = vpack.c.bf16 %v845_v9, %v844_v51 }
 0xc01   :  { %1003 = vrot.lane.b32.xlu0 %v846_v55, %s1761_s1 }
 0xc66   :  { %v879_v10 = vpop.permute.xlu1 %878 }
 0xc67   :  { %v884_v60 = vsel %vm167_vm3, %v879_v10, 0 }
 0xc68   :  { %1580 = vmatpush3.bf16.xpose.msra.mxu0 %v884_v60 }
 0xc69   :  { %1591 = vmatprep.subr.bf16.mxu0 %v1753_v7 }
 0xc6f   :  { %1582 = vmatmul.mubr.msk.bf16.vlgmr.msra.gmra.mxu0 %vm167_vm3, %v846_v55  ;;  %v1667_v55 = vld [vmem:[%s2240_s8 + $0x18] sm:$0xff]  }
 0xc70   :  { %1592 = vmatpush3.bf16.xpose.msra.mxu0 %v884_v60  ;;  %1593 = vmatprep.mubr.msk.bf16.mxu0 %vm1754_vm1, %v1753_v7 }
 0xc71   :  { %1603 = vmatprep.subr.bf16.mxu0 %v1753_v7 }
 0xc73   :  { %v1004_v63 = vpop.permute.xlu0 %1003 }
 0xc77   :  { %1594 = vmatmul.mubr.msk.bf16.vlgmr.msra.gmra.mxu0 %vm167_vm3, %v1004_v63  ;;  %v1668_v63 = vld [vmem:[%s2240_s8 + $0x10] sm:$0xff]  }
 0xc78   :  { %1607 = vmatprep.mubr.msk.bf16.mxu0 %vm1754_vm1, %v1753_v7  ;;  %1604 = vmatpush3.bf16.msra.mxu0 %v1667_v55 }
 0xc79   :  { %1605 = vmatprep.subr.bf16.mxu0 %v1753_v7 }
 0xc7c   :  { %1606 = vmatpush3.bf16.msra.mxu0 %v1668_v63 }
 0xc7d   :  { %1619 = vmatprep.subr.bf16.mxu0 %v1753_v7 }
 0xd2f   :  { %v920_v2 = vpop.f32.mrf.mxu0 }
 0xd30   :  { %v927_v3 = vmul.f32 0.25, %v920_v2 }
 0xd31   :  { %v1583_v11 = vpop.f32.mrf.mxu0 }
 0xd32   :  { %v929_v12 = vadd.f32 %v927_v3, %v1969_v20 }
 0xd33   :  { %v923_v13 = vpop.f32.mrf.mxu0 }
 0xd34   :  { %v928_v14 = vmul.f32 0.25, %v923_v13  ;;  %v931_v15 = vsel %vm167_vm3, %v929_v12, -inf }
 0xd35   :  { %932 = vmax.xlane.f32.xlu1 %v931_v15  ;;  %v1584_v16 = vpop.f32.mrf.mxu0 }
 0xd36   :  { %v930_v17 = vadd.f32 %v928_v14, %v1975_v25 }
 0xd37   :  { %v1042_v18 = vpop.f32.mrf.mxu0 }
 0xd38   :  { %v1049_v21 = vmul.f32 0.25, %v1042_v18  ;;  %v934_v28 = vsel %vm167_vm3, %v930_v17, -inf }
 0xd39   :  { %935 = vmax.xlane.f32.xlu0 %v934_v28  ;;  %v1595_v31 = vpop.f32.mrf.mxu0 }
 0xd3a   :  { %v1051_v22 = vadd.f32 %v1049_v21, %v1969_v20 }
 0xd3b   :  { %v1045_v23 = vpop.f32.mrf.mxu0 }
 0xd3c   :  { %v1050_v24 = vmul.f32 0.25, %v1045_v23  ;;  %v1053_v26 = vsel %vm167_vm3, %v1051_v22, -inf }
 0xd3d   :  { %1054 = vmax.xlane.f32.xlu0 %v1053_v26  ;;  %v1596_v29 = vpop.f32.mrf.mxu0 }
 0xd3e   :  { %v1052_v30 = vadd.f32 %v1050_v24, %v1975_v25 }
 0xd40   :  { %v1056_v33 = vsel %vm167_vm3, %v1052_v30, -inf }
 0xd41   :  { %1057 = vmax.xlane.f32.xlu1 %v1056_v33 }
 0xdbe   :  { %v933_v34 = vpop.xlane.xlu1 %932 }
 0xdbf   :  { %v937_v35 = vsub.f32 %v929_v12, %v933_v34 }
 0xdc1   :  { %v939_v37 = vmul.f32 1.442695, %v937_v35 }
 0xdc2   :  { %v936_v38 = vpop.xlane.xlu0 %935 }
 0xdc3   :  { %1707 = vpow2.f32 %v939_v37  ;;  %v938_v39 = vsub.f32 %v930_v17, %v936_v38 }
 0xdc5   :  { %v941_v40 = vmul.f32 1.442695, %v938_v39 }
 0xdc6   :  { %v1055_v41 = vpop.xlane.xlu0 %1054 }
 0xdc7   :  { %1709 = vpow2.f32 %v941_v40  ;;  %v1059_v20 = vsub.f32 %v1051_v22, %v1055_v41 }
 0xdc9   :  { %v1061_v43 = vmul.f32 1.442695, %v1059_v20 }
 0xdca   :  { %v1058_v44 = vpop.xlane.xlu1 %1057 }
 0xdcb   :  { %1711 = vpow2.f32 %v1061_v43  ;;  %v1060_v42 = vsub.f32 %v1052_v30, %v1058_v44  ;;  %v1446_v44 = vld [vmem:[%s2241_s9 + $0x1] sm:$0x1] }
 0xdcd   :  { %v1063_v45 = vmul.f32 1.442695, %v1060_v42  ;;  %v1212_v42 = vadd.f32 1.0, %v1446_v44 }
 0xdcf   :  { %1713 = vpow2.f32 %v1063_v45 }
 0xdd0   :  { %v1708_v25 = vpop.eup %1707 }
 0xdd1   :  { %v943_v47 = vsel %vm167_vm3, %v1708_v25, 0.0 }
 0xdd2   :  { %944 = vadd.xlane.f32.xlu0 %v943_v47  ;;  %v1217_v47 = vrot.slane %v1212_v42, %v1865_v19  ;;  %v1673_v19 = vld [vmem:[%s2243_s11 + $0x28] sm:$0xff]  }
 0xdd4   :  { %v1710_v36 = vpop.eup %1709 }
 0xdd5   :  { %v946_v49 = vsel %vm167_vm3, %v1710_v36, 0.0 }
 0xdd6   :  { %947 = vadd.xlane.f32.xlu1 %v946_v49 }
 0xdd8   :  { %v1712_v50 = vpop.eup %1711 }
 0xdd9   :  { %v1065_v52 = vsel %vm167_vm3, %v1712_v50, 0.0 }
 0xdda   :  { %1066 = vadd.xlane.f32.xlu0 %v1065_v52 }
 0xddc   :  { %v1714_v53 = vpop.eup %1713 }
 0xddd   :  { %v1068_v54 = vsel %vm167_vm3, %v1714_v53, 0.0 }
 0xdde   :  { %1069 = vadd.xlane.f32.xlu1 %v1068_v54  ;;  %v1671_v54 = vld [vmem:[%s2243_s11 + $0x38] sm:$0xff]  }
 0xdf0   :  { %955 = vrot.lane.b32.xlu0 %v876_v56, %s1762_s5  ;;  %v1672_v56 = vld [vmem:[%s2243_s11 + $0x30] sm:$0xff]  }
 0xe5b   :  { %v945_v57 = vpop.xlane.xlu0 %944 }
 0xe5c   :  { %1715 = vrcp.f32 %v945_v57  ;;  %v1674_v57 = vld [vmem:[%s2243_s11 + $0x20] sm:$0xff]   ;;  %s1765_s11 = smov [#allocation2]  }
 0xe5d   :  { %s1398_s21 = sshll.u32 %s1765_s11, 4  ;;  %s1399_s21 = int_to_ptr.vmem [resolvable:$true] %s1398_s21 }
 0xe5e   :  { %s1731_s22 = scalar_lea.vmem %s1399_s21, 256  ;;  %p1736_p1 = scmp.lt.s32.totalorder %s1399_s21, %s1399_s21 }
 0xe5f   :  { %v948_v58 = vpop.xlane.xlu1 %947  ;;  %p1732_p0 = scmp.ne.s32.totalorder %s1399_s21, %s1731_s22  ;;  %p1737_p2 = scmp.lt.s32.totalorder %s1731_s22, %s1731_s22 }
 0xe60   :  { %1717 = vrcp.f32 %v948_v58 }
 0xe61   :  { %p1738_p3 = por %p1737_p2, %p1736_p1 }
 0xe63   :  { %v1067_v59 = vpop.xlane.xlu0 %1066  ;;  %p1739_p4 = pnand %p1738_p3, %p1732_p0 }
 0xe64   :  { %1719 = vrcp.f32 %v1067_v59 }
 0xe67   :  { %v956_v1 = vpop.permute.xlu0 %955  ;;  %v1070_v48 = vpop.xlane.xlu1 %1069 }
 0xe68   :  { %1721 = vrcp.f32 %v1070_v48  ;;  %1586 = vmatpush3.bf16.msra.mxu1 %v956_v1 }
 0xe69   :  { %1597 = vmatprep.subr.bf16.mxu1 %v1753_v7  ;;  %v1716_v46 = vpop.eup %1715 }
 0xe6a   :  { %v951_v62 = vmul.f32 %v1716_v46, %v1708_v25 }
 0xe6d   :  { %v1718_v61 = vpop.eup %1717 }
 0xe6e   :  { %v952_v5 = vmul.f32 %v1718_v61, %v1710_v36 }
 0xe70   :  { %v953_v6 = vpack.c.bf16 %v952_v5, %v951_v62 }
 0xe71   :  { %v1720_v27 = vpop.eup %1719 }
 0xe72   :  { %1588 = vmatmul.mubr.msk.bf16.vlgmr.msra.gmra.mxu1 %vm167_vm3, %v953_v6  ;;  %v1073_v8 = vmul.f32 %v1720_v27, %v1712_v50 }
 0xe73   :  { %1598 = vmatpush3.bf16.msra.mxu1 %v956_v1  ;;  %1599 = vmatprep.mubr.msk.bf16.mxu1 %vm1754_vm1, %v1753_v7 }
 0xe74   :  { %1611 = vmatprep.subr.bf16.mxu1 %v1753_v7 }
 0xe75   :  { %v1722_v32 = vpop.eup %1721 }
 0xe76   :  { %v1074_v9 = vmul.f32 %v1722_v32, %v1714_v53 }
 0xe78   :  { %v1075_v51 = vpack.c.bf16 %v1074_v9, %v1073_v8 }
 0xe7a   :  { %1600 = vmatmul.mubr.msk.bf16.vlgmr.msra.gmra.mxu1 %vm167_vm3, %v1075_v51 }
 0xe7b   :  { %1615 = vmatprep.mubr.msk.bf16.mxu1 %vm1754_vm1, %v1753_v7 }
 0xf32   :  { %v995_v10 = vpop.f32.mrf.mxu1 }
 0xf34   :  { %v1589_v60 = vpop.f32.mrf.mxu1 }
 0xf36   :  { %v998_v2 = vpop.f32.mrf.mxu1 }
 0xf38   :  { %v1590_v3 = vpop.f32.mrf.mxu1 }
 0xf3a   :  { %v1113_v11 = vpop.f32.mrf.mxu1 }
 0xf3c   :  { %v1601_v12 = vpop.f32.mrf.mxu1 }
 0xf3e   :  { %v1116_v13 = vpop.f32.mrf.mxu1 }
 0xf3f   :  { %v1650_v14 = vpack.i.bf16 %v1116_v13, %v1113_v11 }
 0xf40   :  { %v1602_v15 = vpop.f32.mrf.mxu1 }
 0xf41   :  { %1651 = vrot.lane.b32.xlu1 %v1650_v14, %s1763_s4 }
 0xfb3   :  { %v1652_v16 = vpop.permute.xlu1 %1651 }
 0xfb4   :  { %v1654_v17 = vunpack.i.h.bf16 %v1652_v16  ;;  %v1653_v18 = vunpack.i.l.bf16 %v1652_v16 }
 0xfb6   :  { %v1129_v21 = vsel %vm167_vm3, %v998_v2, %v1654_v17  ;;  %v1128_v28 = vsel %vm167_vm3, %v995_v10, %v1653_v18 }
 0xfb7   :  { %v1130_v31 = vpack.c.bf16 %v1129_v21, %v1128_v28 }
 0xfb9   :  { %1608 = vmatmul.mubr.msk.bf16.vlgmr.msra.gmra.mxu0 %vm58_vm0, %v1130_v31 }
 0xfba   :  { %1627 = vmatprep.mubr.msk.bf16.mxu0 %vm1754_vm1, %v1753_v7  ;;  %1620 = vmatpush3.bf16.msra.mxu0 %v1671_v54 }
 0xfbb   :  { %1621 = vmatprep.subr.bf16.mxu0 %v1753_v7 }
 0xfbe   :  { %1622 = vmatpush3.bf16.msra.mxu0 %v1672_v56 }
 0xfbf   :  { %1623 = vmatprep.subr.bf16.mxu0 %v1753_v7 }
 0xfc2   :  { %1624 = vmatpush3.bf16.msra.mxu0 %v1673_v19 }
 0xfc3   :  { %1625 = vmatprep.subr.bf16.mxu0 %v1753_v7 }
 0xfc6   :  { %1626 = vmatpush3.bf16.msra.mxu0 %v1674_v57 }
0x1079   :  { %v1185_v22 = vpop.f32.mrf.mxu0 }
0x107a   :  { %v2181_v23 = vadd.f32 %v1185_v22, %v2064_v0  ;;  %v1669_v0 = vld [vmem:[%s2242_s10 + $0x18] sm:$0xff]  }
0x107b   :  { %v1609_v24 = vpop.f32.mrf.mxu0  ;;  %1612 = vmatpush3.bf16.msra.mxu1 %v1669_v0 }
0x107c   :  { %v1196_v26 = vmul.f32 %v2181_v23, %v2181_v23  ;;  %1613 = vmatprep.subr.bf16.mxu1 %v1753_v7 }
0x107d   :  { %v1188_v29 = vpop.f32.mrf.mxu0 }
0x107e   :  { %v2186_v30 = vadd.f32 %v1188_v29, %v2069_v4  ;;  %v1198_v33 = vsel %vm58_vm0, %v1196_v26, 0.0  ;;  %v1670_v4 = vld [vmem:[%s2242_s10 + $0x10] sm:$0xff]  }
0x107f   :  { %1199 = vadd.xlane.f32.xlu1 %v1198_v33  ;;  %v1610_v34 = vpop.f32.mrf.mxu0  ;;  %1614 = vmatpush3.bf16.msra.mxu1 %v1670_v4 }
0x1080   :  { %v1197_v35 = vmul.f32 %v2186_v30, %v2186_v30 }
0x1082   :  { %v1201_v37 = vsel %vm58_vm0, %v1197_v35, 0.0 }
0x1083   :  { %1202 = vadd.xlane.f32.xlu0 %v1201_v37 }
0x1108   :  { %v1200_v38 = vpop.xlane.xlu1 %1199 }
0x1109   :  { %v1204_v39 = vmul.f32 0.03125, %v1200_v38 }
0x110b   :  { %v1206_v40 = vadd.f32 1e-06, %v1204_v39 }
0x110c   :  { %v1203_v41 = vpop.xlane.xlu0 %1202 }
0x110d   :  { %1723 = vrsqrt.f32 %v1206_v40  ;;  %v1205_v20 = vmul.f32 0.03125, %v1203_v41 }
0x110f   :  { %v1207_v43 = vadd.f32 1e-06, %v1205_v20 }
0x1111   :  { %1725 = vrsqrt.f32 %v1207_v43 }
0x111a   :  { %v1724_v45 = vpop.eup %1723 }
0x111b   :  { %v1210_v25 = vmul.f32 %v1724_v45, %v2181_v23 }
0x111d   :  { %v1219_v50 = vmul.f32 %v1217_v47, %v1210_v25 }
0x111e   :  { %v1726_v36 = vpop.eup %1725 }
0x111f   :  { %v1211_v49 = vmul.f32 %v1726_v36, %v2186_v30 }
0x1121   :  { %v1220_v52 = vmul.f32 %v1217_v47, %v1211_v49 }
0x1123   :  { %v1221_v53 = vpack.c.bf16 %v1220_v52, %v1219_v50 }
0x1125   :  { %1616 = vmatmul.mubr.msk.bf16.vlgmr.msra.gmra.mxu1 %vm58_vm0, %v1221_v53 }
0x11e5   :  { %v1276_v58 = vpop.f32.mrf.mxu1 }
0x11e6   :  { %1303 = vrot.lane.b32.xlu0 %v1276_v58, %s1764_s24  ;;  %v1285_v46 = vmul.f32 0.044715, %v1276_v58  ;;  %v1283_v63 = vmul.f32 0.5, %v1276_v58 }
0x11e7   :  { %v1617_v59 = vpop.f32.mrf.mxu1 }
0x11e8   :  { %v1287_v62 = vmul.f32 %v1285_v46, %v1276_v58 }
0x11e9   :  { %v1279_v1 = vpop.f32.mrf.mxu1 }
0x11ea   :  { %1305 = vrot.lane.b32.xlu1 %v1279_v1, %s1764_s24  ;;  %v1286_v61 = vmul.f32 0.044715, %v1279_v1  ;;  %v1289_v6 = vmul.f32 %v1287_v62, %v1276_v58  ;;  %v1284_v2 = vmul.f32 0.5, %v1279_v1 }
0x11eb   :  { %v1618_v48 = vpop.f32.mrf.mxu1 }
0x11ec   :  { %v1288_v5 = vmul.f32 %v1286_v61, %v1279_v1  ;;  %v1291_v7 = vadd.f32 %v1289_v6, %v1276_v58 }
0x11ee   :  { %v1290_v27 = vmul.f32 %v1288_v5, %v1279_v1  ;;  %v1293_v8 = vmul.f32 0.7978846, %v1291_v7 }
0x11f0   :  { %v1292_v32 = vadd.f32 %v1290_v27, %v1279_v1  ;;  %1727 = vtanh.f32 %v1293_v8 }
0x11f2   :  { %v1294_v9 = vmul.f32 0.7978846, %v1292_v32 }
0x11f4   :  { %1729 = vtanh.f32 %v1294_v9 }
0x11fd   :  { %v1728_v51 = vpop.eup %1727 }
0x11fe   :  { %v1297_v10 = vadd.f32 1.0, %v1728_v51 }
0x1200   :  { %v1299_v11 = vmul.f32 %v1297_v10, %v1283_v63 }
0x1201   :  { %v1730_v55 = vpop.eup %1729 }
0x1202   :  { %v1298_v60 = vadd.f32 1.0, %v1730_v55 }
0x1204   :  { %v1300_v12 = vmul.f32 %v1298_v60, %v1284_v2 }
0x1258   :  { %v1304_v3 = vpop.permute.xlu0 %1303 }
0x1259   :  { %v1309_v14 = vmul.f32 %v1304_v3, %v1299_v11 }
0x125c   :  { %v1306_v13 = vpop.permute.xlu1 %1305 }
0x125d   :  { %v1310_v15 = vmul.f32 %v1306_v13, %v1300_v12 }
0x125f   :  { %v1311_v16 = vpack.c.bf16 %v1310_v15, %v1309_v14 }
0x1261   :  { %1628 = vmatmul.mubr.msk.bf16.vlgmr.msra.gmra.mxu0 %vm680_vm5, %v1311_v16 }
0x1321   :  { %v1382_v17 = vpop.f32.mrf.mxu0 }
0x1322   :  { %v1389_v18 = vadd.f32 %v1382_v17, %v2181_v23 }
0x1323   :  { %v1629_v21 = vpop.f32.mrf.mxu0 }
0x1324   :  { %1391 = vst.msk [vmem:[#allocation2] sm:$0xff] %vm58_vm0, %v1389_v18 }
0x1325   :  { %v1385_v28 = vpop.f32.mrf.mxu0 }
0x1326   :  { %v1390_v31 = vadd.f32 %v1385_v28, %v2186_v30 }
0x1327   :  { %v1630_v22 = vpop.f32.mrf.mxu0 }
0x1328   :  { %1392 = vst.msk [vmem:[#allocation2 + $0x8] sm:$0xff] %vm58_vm0, %v1390_v31 }
0x1329   :  { %1742 = shalt.err (!%p1739_p4)
}
0x132a   :  { %s1766_s23 = smov 128  }
0x132b   :  { %1404 = dma.vmem_to_hbm [thread:$0]  %s1399_s21, 256, %s2244_s12, [#allocation3], %s1766_s23, %s1766_s23, %s1758_s15  }
0x132c   :  { %1751 = dma.done.wait [#allocation3], 256  }
0x132d   :  { %1752 = vsyncadd [#allocation3], 4294967040 }
0x132e   :  { %1408 = vsyncpa [#allocation3], 1 }

</bundles_post_ra>
